<compile_context>
chip_gen: v7x
topology: tpu7x:2x2x1
jax: 0.10.0
libtpu: 0.0.40
codegen_flags: <defaults>
</compile_context>

<pallas_src>
import functools

import jax
import jax.numpy as jnp
from jax.experimental import pallas as pl
from jax.experimental.pallas import tpu as pltpu

NZ = 64            # latent dim (opt.nz)
H1, H2 = 256, 512
OUT_DIM = 784
OUT_PAD = 896      # 7 * 128 -> lane-dense output tile


def _round_up(x, m):
    return (x + m - 1) // m * m


def generator_kernel(z_ref, w1_ref, b1_ref, w2_ref, b2_ref, w3_ref, b3_ref,
                     out_ref):
    # Layer 1: Linear(nz, 256) + ReLU   (bf16 operands, f32 accumulation)
    h1 = jnp.dot(z_ref[...], w1_ref[...],
                 preferred_element_type=jnp.float32) + b1_ref[...]
    h1 = jnp.maximum(h1, 0.0)
    # Layer 2: Linear(256, 512) + ReLU
    h2 = jnp.dot(h1.astype(w2_ref.dtype), w2_ref[...],
                 preferred_element_type=jnp.float32) + b2_ref[...]
    h2 = jnp.maximum(h2, 0.0)
    # Layer 3: Linear(512, 784 padded to 896) + Tanh
    h3 = jnp.dot(h2.astype(w3_ref.dtype), w3_ref[...],
                 preferred_element_type=jnp.float32) + b3_ref[...]
    out_ref[...] = jnp.tanh(h3).astype(out_ref.dtype)


@functools.partial(jax.jit, static_argnames=("tile_b",))
def generator_forward(z, w1, b1, w2, b2, w3, b3, *, tile_b=256):
    batch, nz = z.shape
    out_pad = w3.shape[1]

    # Pad the batch to a multiple of the tile; padded rows are sliced off.
    padded_batch = _round_up(batch, tile_b)
    zb = z.astype(jnp.bfloat16)
    if padded_batch != batch:
        zb = jnp.pad(zb, ((0, padded_batch - batch), (0, 0)))

    grid = (padded_batch // tile_b,)

    # Weights / biases: same block every grid step -> DMA'd once, VMEM-resident.
    resident = lambda shape: pl.BlockSpec(shape, lambda i: (0,) * len(shape))

    out = pl.pallas_call(
        generator_kernel,
        out_shape=jax.ShapeDtypeStruct((padded_batch, out_pad), jnp.float32),
        grid_spec=pltpu.PrefetchScalarGridSpec(
            num_scalar_prefetch=0,
            grid=grid,
            in_specs=[
                pl.BlockSpec((tile_b, nz), lambda i: (i, 0)),   # z tile
                resident(w1.shape), resident(b1.shape),
                resident(w2.shape), resident(b2.shape),
                resident(w3.shape), resident(b3.shape),
            ],
            out_specs=pl.BlockSpec((tile_b, out_pad), lambda i: (i, 0)),
        ),
        compiler_params=pltpu.CompilerParams(
            dimension_semantics=("parallel",),   # batch tiles independent; v7x 2 TCs
            vmem_limit_bytes=32 * 1024 * 1024,
        ),
    )(zb, w1, b1, w2, b2, w3, b3)

    return out[:batch, :OUT_DIM]


def init_linear(key, fan_in, fan_out, pad_out=None):
    # Mimic PyTorch nn.Linear default init: U(-1/sqrt(fan_in), 1/sqrt(fan_in)).
    kw, kb = jax.random.split(key)
    bound = 1.0 / jnp.sqrt(fan_in)
    # Stored as (in, out) so forward is x @ W + b (pre-transposed vs torch).
    w = jax.random.uniform(kw, (fan_in, fan_out), jnp.float32, -bound, bound)
    b = jax.random.uniform(kb, (1, fan_out), jnp.float32, -bound, bound)
    if pad_out is not None and pad_out > fan_out:
        w = jnp.pad(w, ((0, 0), (0, pad_out - fan_out)))
        b = jnp.pad(b, ((0, 0), (0, pad_out - fan_out)))
    # Weights streamed as bf16 (DMA-bound kernel); biases kept f32.
    return w.astype(jnp.bfloat16), b


def reference_forward(z, w1, b1, w2, b2, w3, b3):
    # Mirrors the kernel's mixed precision: bf16 operands, f32 accumulate.
    f32 = jnp.float32
    zf = z.astype(jnp.bfloat16).astype(f32)
    w1f, w2f, w3f = w1.astype(f32), w2.astype(f32), w3.astype(f32)
    h1 = jnp.maximum(zf @ w1f + b1, 0.0)
    h1 = h1.astype(jnp.bfloat16).astype(f32)
    h2 = jnp.maximum(h1 @ w2f + b2, 0.0)
    h2 = h2.astype(jnp.bfloat16).astype(f32)
    out = jnp.tanh(h2 @ w3f + b3)
    return out[:, :OUT_DIM]


if __name__ == "__main__":
    batch = 200          # deliberately not a tile multiple -> exercises padding
    tile_b = 128

    key = jax.random.PRNGKey(0)
    kz, k1, k2, k3 = jax.random.split(key, 4)

    z = jax.random.normal(kz, (batch, NZ), jnp.float32)
    w1, b1 = init_linear(k1, NZ, H1)
    w2, b2 = init_linear(k2, H1, H2)
    w3, b3 = init_linear(k3, H2, OUT_DIM, pad_out=OUT_PAD)

    out = generator_forward(z, w1, b1, w2, b2, w3, b3, tile_b=tile_b)
    out = jax.block_until_ready(out)

    ref = reference_forward(z, w1, b1, w2, b2, w3, b3)
    assert out.shape == (batch, OUT_DIM), out.shape
    assert jnp.all(jnp.isfinite(out))
    assert jnp.allclose(out, ref, atol=2e-2, rtol=2e-2)

    print("KERNEL_OK")
</pallas_src>

<mosaic_0001>
module attributes {stable_mosaic.version = 11 : i64} {
  func.func @generator_kernel(%arg0: i32, %arg1: memref<128x64xbf16, #tpu.memory_space<vmem>>, %arg2: memref<64x256xbf16, #tpu.memory_space<vmem>>, %arg3: memref<1x256xf32, #tpu.memory_space<vmem>>, %arg4: memref<256x512xbf16, #tpu.memory_space<vmem>>, %arg5: memref<1x512xf32, #tpu.memory_space<vmem>>, %arg6: memref<512x896xbf16, #tpu.memory_space<vmem>>, %arg7: memref<1x896xf32, #tpu.memory_space<vmem>>, %arg8: memref<128x896xf32, #tpu.memory_space<vmem>>) attributes {dimension_semantics = [#tpu.dimension_semantics<parallel>], iteration_bounds = array<i64: 2>, scalar_prefetch = 0 : i64, scratch_operands = 0 : i64, tpu.core_type = #tpu.core_type<tc>, window_params = [{transform_indices = @transform_0, window_bounds = array<i64: 128, 64>}, {pipeline_mode = #tpu.pipeline_mode<synchronous>, transform_indices = @transform_1, window_bounds = array<i64: 64, 256>}, {pipeline_mode = #tpu.pipeline_mode<synchronous>, transform_indices = @transform_2, window_bounds = array<i64: 1, 256>}, {pipeline_mode = #tpu.pipeline_mode<synchronous>, transform_indices = @transform_3, window_bounds = array<i64: 256, 512>}, {pipeline_mode = #tpu.pipeline_mode<synchronous>, transform_indices = @transform_4, window_bounds = array<i64: 1, 512>}, {pipeline_mode = #tpu.pipeline_mode<synchronous>, transform_indices = @transform_5, window_bounds = array<i64: 512, 896>}, {pipeline_mode = #tpu.pipeline_mode<synchronous>, transform_indices = @transform_6, window_bounds = array<i64: 1, 896>}, {transform_indices = @transform_7, window_bounds = array<i64: 128, 896>}]} {
    %c0 = arith.constant 0 : index
    %c0_0 = arith.constant 0 : index
    %0 = vector.load %arg1[%c0, %c0_0] : memref<128x64xbf16, #tpu.memory_space<vmem>>, vector<128x64xbf16>
    %c0_1 = arith.constant 0 : index
    %c0_2 = arith.constant 0 : index
    %1 = vector.load %arg2[%c0_1, %c0_2] : memref<64x256xbf16, #tpu.memory_space<vmem>>, vector<64x256xbf16>
    %cst = arith.constant dense<0.000000e+00> : vector<128x256xf32>
    %2 = tpu.matmul %0, %1, %cst {dimension_numbers = #tpu.dot_dimension_numbers<[1], [0], [0], [1], [0, 0, 1, 1], [], []>} : vector<128x64xbf16>, vector<64x256xbf16>, vector<128x256xf32> -> vector<128x256xf32>
    %c0_3 = arith.constant 0 : index
    %c0_4 = arith.constant 0 : index
    %3 = vector.load %arg3[%c0_3, %c0_4] : memref<1x256xf32, #tpu.memory_space<vmem>>, vector<1x256xf32>
    %4 = vector.broadcast %3 : vector<1x256xf32> to vector<128x256xf32>
    %5 = arith.addf %2, %4 : vector<128x256xf32>
    %cst_5 = arith.constant 0.000000e+00 : f32
    %6 = vector.broadcast %cst_5 : f32 to vector<128x256xf32>
    %7 = arith.maximumf %5, %6 : vector<128x256xf32>
    %8 = arith.truncf %7 : vector<128x256xf32> to vector<128x256xbf16>
    %c0_6 = arith.constant 0 : index
    %c0_7 = arith.constant 0 : index
    %9 = vector.load %arg4[%c0_6, %c0_7] : memref<256x512xbf16, #tpu.memory_space<vmem>>, vector<256x512xbf16>
    %cst_8 = arith.constant dense<0.000000e+00> : vector<128x512xf32>
    %10 = tpu.matmul %8, %9, %cst_8 {dimension_numbers = #tpu.dot_dimension_numbers<[1], [0], [0], [1], [0, 0, 1, 1], [], []>} : vector<128x256xbf16>, vector<256x512xbf16>, vector<128x512xf32> -> vector<128x512xf32>
    %c0_9 = arith.constant 0 : index
    %c0_10 = arith.constant 0 : index
    %11 = vector.load %arg5[%c0_9, %c0_10] : memref<1x512xf32, #tpu.memory_space<vmem>>, vector<1x512xf32>
    %12 = vector.broadcast %11 : vector<1x512xf32> to vector<128x512xf32>
    %13 = arith.addf %10, %12 : vector<128x512xf32>
    %cst_11 = arith.constant 0.000000e+00 : f32
    %14 = vector.broadcast %cst_11 : f32 to vector<128x512xf32>
    %15 = arith.maximumf %13, %14 : vector<128x512xf32>
    %16 = arith.truncf %15 : vector<128x512xf32> to vector<128x512xbf16>
    %c0_12 = arith.constant 0 : index
    %c0_13 = arith.constant 0 : index
    %17 = vector.load %arg6[%c0_12, %c0_13] : memref<512x896xbf16, #tpu.memory_space<vmem>>, vector<512x896xbf16>
    %cst_14 = arith.constant dense<0.000000e+00> : vector<128x896xf32>
    %18 = tpu.matmul %16, %17, %cst_14 {dimension_numbers = #tpu.dot_dimension_numbers<[1], [0], [0], [1], [0, 0, 1, 1], [], []>} : vector<128x512xbf16>, vector<512x896xbf16>, vector<128x896xf32> -> vector<128x896xf32>
    %c0_15 = arith.constant 0 : index
    %c0_16 = arith.constant 0 : index
    %19 = vector.load %arg7[%c0_15, %c0_16] : memref<1x896xf32, #tpu.memory_space<vmem>>, vector<1x896xf32>
    %20 = vector.broadcast %19 : vector<1x896xf32> to vector<128x896xf32>
    %21 = arith.addf %18, %20 : vector<128x896xf32>
    %22 = math.tanh %21 : vector<128x896xf32>
    %c0_17 = arith.constant 0 : index
    %c0_18 = arith.constant 0 : index
    %23 = vector.load %arg8[%c0_17, %c0_18] : memref<128x896xf32, #tpu.memory_space<vmem>>, vector<128x896xf32>
    tpu.vector_store %arg8[%c0_17, %c0_18], %22 {strides = array<i32>} : memref<128x896xf32, #tpu.memory_space<vmem>>, vector<128x896xf32>,
    return
  }
  func.func @transform_0(%arg0: i32) -> (i32, i32) {
    %c0_i32 = arith.constant 0 : i32
    %c0_i32_0 = arith.constant 0 : i32
    return %arg0, %c0_i32 : i32, i32
  }
  func.func @transform_1(%arg0: i32) -> (i32, i32) {
    %c0_i32 = arith.constant 0 : i32
    %c0_i32_0 = arith.constant 0 : i32
    %c0_i32_1 = arith.constant 0 : i32
    return %c0_i32, %c0_i32_0 : i32, i32
  }
  func.func @transform_2(%arg0: i32) -> (i32, i32) {
    %c0_i32 = arith.constant 0 : i32
    %c0_i32_0 = arith.constant 0 : i32
    %c0_i32_1 = arith.constant 0 : i32
    return %c0_i32, %c0_i32_0 : i32, i32
  }
  func.func @transform_3(%arg0: i32) -> (i32, i32) {
    %c0_i32 = arith.constant 0 : i32
    %c0_i32_0 = arith.constant 0 : i32
    %c0_i32_1 = arith.constant 0 : i32
    return %c0_i32, %c0_i32_0 : i32, i32
  }
  func.func @transform_4(%arg0: i32) -> (i32, i32) {
    %c0_i32 = arith.constant 0 : i32
    %c0_i32_0 = arith.constant 0 : i32
    %c0_i32_1 = arith.constant 0 : i32
    return %c0_i32, %c0_i32_0 : i32, i32
  }
  func.func @transform_5(%arg0: i32) -> (i32, i32) {
    %c0_i32 = arith.constant 0 : i32
    %c0_i32_0 = arith.constant 0 : i32
    %c0_i32_1 = arith.constant 0 : i32
    return %c0_i32, %c0_i32_0 : i32, i32
  }
  func.func @transform_6(%arg0: i32) -> (i32, i32) {
    %c0_i32 = arith.constant 0 : i32
    %c0_i32_0 = arith.constant 0 : i32
    %c0_i32_1 = arith.constant 0 : i32
    return %c0_i32, %c0_i32_0 : i32, i32
  }
  func.func @transform_7(%arg0: i32) -> (i32, i32) {
    %c0_i32 = arith.constant 0 : i32
    %c0_i32_0 = arith.constant 0 : i32
    return %arg0, %c0_i32 : i32, i32
  }
}

</mosaic_0001>

<bundles_post_ra>
// kernel: generator_forward.1
= control target key start
LH: loop header
LB: loop body
LE: loop exit
PB: predicated region body
PF: predicated region fallthrough
CT: control target
= control target key end

     0   :  { %12 = vsyncpa [#allocation3], 0  ;;  %s5369_s24 = smov 0   ;;  %s6359_s0 = inlined_call_operand.vmem [shape: bf16[256,64], index: 0, kind: input, shape index: {}]   ;;  %s6360_s1 = inlined_call_operand.vmem [shape: bf16[64,256], index: 1, kind: input, shape index: {}]   ;;  %s6361_s2 = inlined_call_operand.vmem [shape: f32[1,256], index: 2, kind: input, shape index: {}]   ;;  %s6362_s3 = inlined_call_operand.vmem [shape: bf16[256,512], index: 3, kind: input, shape index: {}]   ;;  %s6363_s4 = inlined_call_operand.vmem [shape: f32[1,512], index: 4, kind: input, shape index: {}]   ;;  %s6364_s5 = inlined_call_operand.hbm [shape: bf16[512,896], index: 5, kind: input, shape index: {}]   ;;  %s6365_s6 = inlined_call_operand.vmem [shape: f32[1,896], index: 6, kind: input, shape index: {}]   ;;  %s6366_s7 = inlined_call_operand.vmem [shape: f32[256,896], index: 7, kind: output, shape index: {}]  }
   0x1 LB: > { %s3941_s25 = sadd.s32 4294967295, %s5323_s24   ;;  %p3943_p0 = scmp.ge.s32.totalorder %s5323_s24, 1  ;;  %s5323_s24 = sphi %s5369_s24, %s18_s24  }
   0x2   : > { %p201_p1 = scmp.lt.s32.totalorder %s5323_s24, 3  ;;  %s5325_s26 = smov [#allocation2]  }
   0x3   : > { %s225_s27 = sshll.u32 %s5325_s26, 4  ;;  %p5383_p3 = scmp.eq.s32.totalorder %s3941_s25, 0  ;;  %s226_s27 = int_to_ptr.vmem [resolvable:$true] %s225_s27 }
   0x4   : > { %p5377_p2 = pnand %p3943_p0, %p201_p1  ;;  %s5285_s10 = scalar_lea.hbm %s6364_s5, 28672 }
   0x5   : > { %s6371_s29 = scalar_select %p5383_p3, 1, 0 }
   0x6   : > { %s6370_s28 = scalar_select %p5377_p2, 1, 0 }
   0x7   : > { %p4607_p4 = pneg %p5377_p2  ;;  %p5286_p6 = scmp.ne.s32.totalorder %s6364_s5, %s5285_s10 }
   0x8   : > { %p5292_p10 = scmp.lt.u32.totalorder %s5285_s10, %s6364_s5 }
   0x9   : > { %p5391_p5 = pnand %p5383_p3, %p4607_p4 }
   0xb   : > { %p5287_p7 = pneg %p5391_p5 }
   0xd   : > { %p5288_p8 = pnand %p5287_p7, %p5286_p6 }
   0xf   : > { %p5289_p9 = pneg %p5288_p8 }
  0x11   : > { %p5294_p11 = pnand %p5292_p10, %p5289_p9 }
  0x13   : > { %5297 = shalt.err (!%p5294_p11)
}
  0x14   : > { %s5298_s15 = scalar_lea.vmem %s226_s27, 28672  ;;  %p5306_p1 = scmp.lt.s32.totalorder %s226_s27, %s226_s27 }
  0x15   : > { %p5299_p12 = scmp.ne.s32.totalorder %s226_s27, %s5298_s15  ;;  %p5307_p4 = scmp.lt.s32.totalorder %s5298_s15, %s5298_s15 }
  0x17   : > { %p5301_p13 = pnand %p5299_p12, %p5287_p7  ;;  %p5308_p3 = por %p5307_p4, %p5306_p1 }
  0x19   : > { %p5302_p0 = pneg %p5301_p13 }
  0x1b   : > { %p5309_p2 = pnand %p5308_p3, %p5302_p0 }
  0x1d   : > { %5312 = shalt.err (!%p5309_p2)
}
  0x1e   : > { %s5326_s16 = smov 448   ;;  %s5327_s17 = smov 28  }
  0x1f   : > { %4610 = dma.hbm_to_vmem [thread:$0]  (!%p5391_p5), %s6364_s5, 28672, %s226_s27, [#allocation3], %s5326_s16, %s5326_s16, %s5327_s17  }
  0x20   : > { %p6373_p6 = scmp.ne.s32.totalorder %s6370_s28, 0 }
  0x21   : > { %p6374_p8 = scmp.ne.s32.totalorder (!%p6373_p6), %s6371_s29, 0 }
  0x22   : > { %253 = sbr.rel (%p6373_p6) target bundleno = 992 (0x3e0), region = 48 }
  0x29   : > { %5318 = dma.done.wait (%p6374_p8), [#allocation3], 28672  }
  0x2a   : > { %5320 = vsyncadd (%p6374_p8), [#allocation3], 4294938624  ;;  %s3948_s20 = sshll.u32 %s3941_s25, 4  ;;  %v5328_v0 = vmov 0   ;;  %v4625_v1 = vld [vmem:[%s6360_s1 + $0x4] ss:$8 sps:$4 sm:$0xff]  }
  0x2b   : > { %473 = vmatprep.mubr.bf16.mxu0 %v5328_v0  ;;  %p287_p2 = scmp.lt.s32.totalorder %s3948_s20, 31  ;;  %v4627_v2 = vld [vmem:[%s6360_s1] ss:$8 sps:$4 sm:$0xff]   ;;  %441 = vmatprep.subr.bf16.mxu0 %v4625_v1  ;;  %v4628_v3 = vld [vmem:[%s6360_s1 + $0x14] ss:$8 sps:$4 sm:$0xff]   ;;  %vm416_vm0 = vcmask 523264  }
  0x2c   : > { %442 = vmatpush1.bf16.msra.mxu0 %v4627_v2  ;;  %v4630_v4 = vld [vmem:[%s6360_s1 + $0x10] ss:$8 sps:$4 sm:$0xff]   ;;  %v4631_v5 = vld [vmem:[%s6360_s1 + $0x24] ss:$8 sps:$4 sm:$0xff]   ;;  %v4633_v6 = vld [vmem:[%s6360_s1 + $0x20] ss:$8 sps:$4 sm:$0xff]  }
  0x2d   : > { %s6376_s20 = smov (!%p287_p2, %s3948_s20), 31  ;;  %443 = vmatprep.subr.bf16.mxu0 %v4628_v3  ;;  %v4634_v7 = vld [vmem:[%s6360_s1 + $0x34] ss:$8 sps:$4 sm:$0xff]   ;;  %v4636_v8 = vld [vmem:[%s6360_s1 + $0x30] ss:$8 sps:$4 sm:$0xff]  }
  0x2e   : > { %s3949_s27 = sshll.u32 %s6376_s20, 2  ;;  %v4645_v10 = vld [vmem:[%s6362_s3 + $0x4] ss:$16 sps:$4 sm:$0xff]   ;;  %v4647_v11 = vld [vmem:[%s6362_s3 + $0x8] ss:$16 sps:$4 sm:$0xff]   ;;  %s4602_s11 = smul.u32 56, %s6376_s20 }
  0x2f   : > { %s5441_s12 = scalar_lea.vmem %s6359_s0, %s3949_s27  ;;  %v4649_v12 = vld [vmem:[%s6362_s3 + $0xc] ss:$16 sps:$4 sm:$0xff]   ;;  %v4650_v13 = vld [vmem:[%s6362_s3] ss:$16 sps:$4 sm:$0xff]   ;;  %1008 = vmatprep.subr.bf16.mxu1 %v4645_v10  ;;  %v4651_v14 = vld [vmem:[%s6362_s3 + $0x24] ss:$16 sps:$4 sm:$0xff]  }
  0x30   : > { %444 = vmatpush1.bf16.msra.mxu0 %v4630_v4  ;;  %v4637_v9 = vld [vmem:[%s5441_s12] sm:$0xff]   ;;  %1009 = vmatpush1.bf16.msra.mxu1 %v4650_v13  ;;  %v4653_v15 = vld [vmem:[%s6362_s3 + $0x28] ss:$16 sps:$4 sm:$0xff]   ;;  %v4655_v16 = vld [vmem:[%s6362_s3 + $0x2c] ss:$16 sps:$4 sm:$0xff]   ;;  %s6093_s15 = scalar_lea.vmem %s6366_s7, %s4602_s11 }
  0x31   : > { %445 = vmatprep.subr.bf16.mxu0 %v4631_v5  ;;  %1010 = vmatprep.subr.bf16.mxu1 %v4651_v14  ;;  %v4656_v17 = vld [vmem:[%s6362_s3 + $0x20] ss:$16 sps:$4 sm:$0xff]   ;;  %v4657_v18 = vld [vmem:[%s6362_s3 + $0x44] ss:$16 sps:$4 sm:$0xff]   ;;  %v4638_v19 = vld [vmem:[%s5441_s12 + $0x8] sm:$0xff]  }
  0x32   : > { %v4661_v20 = vld [vmem:[%s6362_s3 + $0x4c] ss:$16 sps:$4 sm:$0xff]   ;;  %v4662_v21 = vld [vmem:[%s6362_s3 + $0x40] ss:$16 sps:$4 sm:$0xff]   ;;  %v4663_v22 = vld [vmem:[%s6362_s3 + $0x64] ss:$16 sps:$4 sm:$0xff]  }
  0x33   : > { %v4659_v23 = vld [vmem:[%s6362_s3 + $0x48] ss:$16 sps:$4 sm:$0xff]   ;;  %v4667_v24 = vld [vmem:[%s6362_s3 + $0x6c] ss:$16 sps:$4 sm:$0xff]   ;;  %v4668_v25 = vld [vmem:[%s6362_s3 + $0x60] ss:$16 sps:$4 sm:$0xff]  }
  0x34   : > { %446 = vmatpush1.bf16.msra.mxu0 %v4633_v6  ;;  %1011 = vmatpush1.bf16.msra.mxu1 %v4656_v17  ;;  %v4669_v26 = vld [vmem:[%s6362_s3 + $0x84] ss:$16 sps:$4 sm:$0xff]   ;;  %v4665_v27 = vld [vmem:[%s6362_s3 + $0x68] ss:$16 sps:$4 sm:$0xff]   ;;  %v4673_v29 = vld [vmem:[%s6362_s3 + $0x8c] ss:$16 sps:$4 sm:$0xff]  }
  0x35   : > { %447 = vmatprep.subr.bf16.mxu0 %v4634_v7  ;;  %1012 = vmatprep.subr.bf16.mxu1 %v4657_v18  ;;  %v4639_v28 = vld [vmem:[%s5441_s12 + $0x10] sm:$0xff]   ;;  %v4671_v32 = vld [vmem:[%s6362_s3 + $0x88] ss:$16 sps:$4 sm:$0xff]   ;;  %v4679_v33 = vld [vmem:[%s6362_s3 + $0xac] ss:$16 sps:$4 sm:$0xff]  }
  0x36   : > { %v4674_v30 = vld [vmem:[%s6362_s3 + $0x80] ss:$16 sps:$4 sm:$0xff]   ;;  %v4675_v31 = vld [vmem:[%s6362_s3 + $0xa4] ss:$16 sps:$4 sm:$0xff]   ;;  %v4677_v36 = vld [vmem:[%s6362_s3 + $0xa8] ss:$16 sps:$4 sm:$0xff]  }
  0x37   : > { %v4680_v34 = vld [vmem:[%s6362_s3 + $0xa0] ss:$16 sps:$4 sm:$0xff]   ;;  %v4681_v35 = vld [vmem:[%s6362_s3 + $0xc4] ss:$16 sps:$4 sm:$0xff]   ;;  %v4640_v37 = vld [vmem:[%s5441_s12 + $0x18] sm:$0xff]  }
  0x38   : > { %448 = vmatpush1.bf16.msra.mxu0 %v4636_v8  ;;  %1013 = vmatpush1.bf16.msra.mxu1 %v4662_v21  ;;  %v4685_v38 = vld [vmem:[%s6362_s3 + $0xcc] ss:$16 sps:$4 sm:$0xff]   ;;  %v4686_v39 = vld [vmem:[%s6362_s3 + $0xc0] ss:$16 sps:$4 sm:$0xff]   ;;  %v4687_v40 = vld [vmem:[%s6362_s3 + $0xe4] ss:$16 sps:$4 sm:$0xff]  }
  0x39   : > { %1121 = vmatprep.subr.bf16.mxu0 %v4649_v12  ;;  %1014 = vmatprep.subr.bf16.mxu1 %v4663_v22  ;;  %v4683_v41 = vld [vmem:[%s6362_s3 + $0xc8] ss:$16 sps:$4 sm:$0xff]   ;;  %v4691_v42 = vld [vmem:[%s6362_s3 + $0xec] ss:$16 sps:$4 sm:$0xff]   ;;  %v4692_v43 = vld [vmem:[%s6362_s3 + $0xe0] ss:$16 sps:$4 sm:$0xff]  }
  0x3a   : > { %v4693_v44 = vld [vmem:[%s6362_s3 + $0x104] ss:$16 sps:$4 sm:$0xff]   ;;  %v4689_v45 = vld [vmem:[%s6362_s3 + $0xe8] ss:$16 sps:$4 sm:$0xff]   ;;  %v4697_v47 = vld [vmem:[%s6362_s3 + $0x10c] ss:$16 sps:$4 sm:$0xff]  }
  0x3b   : > { %3968 = vmatmul.mubr.msk.bf16.vlgmr.msra.gmra.mrb[0].mxu0 %vm416_vm0, %v4637_v9  ;;  %v4641_v46 = vld [vmem:[%s5441_s12 + $0x20] sm:$0xff]   ;;  %v4695_v50 = vld [vmem:[%s6362_s3 + $0x108] ss:$16 sps:$4 sm:$0xff]   ;;  %v4703_v51 = vld [vmem:[%s6362_s3 + $0x12c] ss:$16 sps:$4 sm:$0xff]  }
  0x3c   : > { %483 = vmatprep.mubr.bf16.mxu0 %v5328_v0  ;;  %1122 = vmatpush1.bf16.msra.mxu0 %v4647_v11  ;;  %v4698_v48 = vld [vmem:[%s6362_s3 + $0x100] ss:$16 sps:$4 sm:$0xff]   ;;  %v4699_v49 = vld [vmem:[%s6362_s3 + $0x124] ss:$16 sps:$4 sm:$0xff]   ;;  %v4701_v52 = vld [vmem:[%s6362_s3 + $0x128] ss:$16 sps:$4 sm:$0xff]  }
  0x3d   : > { %1123 = vmatprep.subr.bf16.mxu0 %v4655_v16  ;;  %1015 = vmatpush1.bf16.msra.mxu1 %v4668_v25  ;;  %v4704_v53 = vld [vmem:[%s6362_s3 + $0x120] ss:$16 sps:$4 sm:$0xff]   ;;  %v4705_v54 = vld [vmem:[%s6362_s3 + $0x144] ss:$16 sps:$4 sm:$0xff]   ;;  %v4709_v55 = vld [vmem:[%s6362_s3 + $0x14c] ss:$16 sps:$4 sm:$0xff]  }
  0x3e   : > { %1016 = vmatprep.subr.bf16.mxu1 %v4669_v26  ;;  %v4710_v56 = vld [vmem:[%s6362_s3 + $0x140] ss:$16 sps:$4 sm:$0xff]   ;;  %v4642_v57 = vld [vmem:[%s5441_s12 + $0x28] sm:$0xff]   ;;  %v4711_v58 = vld [vmem:[%s6362_s3 + $0x164] ss:$16 sps:$4 sm:$0xff]  }
  0x3f   : > { %v4707_v59 = vld [vmem:[%s6362_s3 + $0x148] ss:$16 sps:$4 sm:$0xff]   ;;  %v4715_v60 = vld [vmem:[%s6362_s3 + $0x16c] ss:$16 sps:$4 sm:$0xff]   ;;  %v4716_v61 = vld [vmem:[%s6362_s3 + $0x160] ss:$16 sps:$4 sm:$0xff]  }
  0x40   : > { %1124 = vmatpush1.bf16.msra.mxu0 %v4653_v15  ;;  %v4717_v62 = vld [vmem:[%s6362_s3 + $0x184] ss:$16 sps:$4 sm:$0xff]   ;;  %v4713_v63 = vld [vmem:[%s6362_s3 + $0x168] ss:$16 sps:$4 sm:$0xff]   ;;  %v4721_v1 = vld [vmem:[%s6362_s3 + $0x18c] ss:$16 sps:$4 sm:$0xff]  }
  0x41   : > { %1125 = vmatprep.subr.bf16.mxu0 %v4661_v20  ;;  %1017 = vmatpush1.bf16.msra.mxu1 %v4674_v30  ;;  %v4722_v2 = vld [vmem:[%s6362_s3 + $0x180] ss:$16 sps:$4 sm:$0xff]   ;;  %v4723_v4 = vld [vmem:[%s6362_s3 + $0x1a4] ss:$16 sps:$4 sm:$0xff]   ;;  %v4719_v5 = vld [vmem:[%s6362_s3 + $0x188] ss:$16 sps:$4 sm:$0xff]  }
  0x42   : > { %1018 = vmatprep.subr.bf16.mxu1 %v4675_v31  ;;  %v4643_v3 = vld [vmem:[%s5441_s12 + $0x30] sm:$0xff]   ;;  %v4727_v6 = vld [vmem:[%s6362_s3 + $0x1ac] ss:$16 sps:$4 sm:$0xff]   ;;  %v4725_v7 = vld [vmem:[%s6362_s3 + $0x1a8] ss:$16 sps:$4 sm:$0xff]  }
  0x43   : > { %3969 = vmatmul.mubr.msk.bf16.gmra.mrb[4].mxu0 %vm416_vm0, %v4638_v19  ;;  %v4644_v8 = vld [vmem:[%s5441_s12 + $0x38] sm:$0xff]   ;;  %v4728_v9 = vld [vmem:[%s6362_s3 + $0x1a0] ss:$16 sps:$4 sm:$0xff]   ;;  %v4729_v10 = vld [vmem:[%s6362_s3 + $0x1c4] ss:$16 sps:$4 sm:$0xff]   ;;  %v326_v19 = vlaneseq }
  0x44   : > { %493 = vmatprep.mubr.bf16.mxu0 %v5328_v0  ;;  %1126 = vmatpush1.bf16.msra.mxu0 %v4659_v23  ;;  %v4733_v11 = vld [vmem:[%s6362_s3 + $0x1cc] ss:$16 sps:$4 sm:$0xff]   ;;  %v4734_v12 = vld [vmem:[%s6362_s3 + $0x1c0] ss:$16 sps:$4 sm:$0xff]   ;;  %v4735_v13 = vld [vmem:[%s6362_s3 + $0x1e4] ss:$16 sps:$4 sm:$0xff]  }
  0x45   : > { %1127 = vmatprep.subr.bf16.mxu0 %v4667_v24  ;;  %1019 = vmatpush1.bf16.msra.mxu1 %v4680_v34  ;;  %v4739_v14 = vld [vmem:[%s6362_s3 + $0x1ec] ss:$16 sps:$4 sm:$0xff]   ;;  %v4737_v15 = vld [vmem:[%s6362_s3 + $0x1e8] ss:$16 sps:$4 sm:$0xff]   ;;  %v4740_v16 = vld [vmem:[%s6362_s3 + $0x1e0] ss:$16 sps:$4 sm:$0xff]  }
  0x46   : > { %1020 = vmatprep.subr.bf16.mxu1 %v4681_v35  ;;  %v4743_v17 = vld [vmem:[#allocation2 + $0x4] ss:$28 sps:$4 sm:$0xff]   ;;  %v4746_v18 = vld [vmem:[#allocation2 + $0xc] ss:$28 sps:$4 sm:$0xff]   ;;  %v5667_v20 = vshrl.u32 %v326_v19, 7 }
  0x47   : > { %v324_v22 = vld [vmem:[%s6361_s2] sm:$0x3] }
  0x48   : > { %1128 = vmatpush1.bf16.msra.mxu0 %v4665_v27  ;;  %v5670_v21 = vsub.s32 0, %v5667_v20  ;;  %v5676_v23 = vsub.s32 1, %v5667_v20 }
  0x49   : > { %1129 = vmatprep.subr.bf16.mxu0 %v4673_v29  ;;  %1021 = vmatpush1.bf16.msra.mxu1 %v4686_v39 }
  0x4a   : > { %1022 = vmatprep.subr.bf16.mxu1 %v4687_v40  ;;  %v5679_v24 = vrot.slane %v324_v22, %v5670_v21  ;;  %v5682_v25 = vrot.slane %v324_v22, %v5676_v23 }
  0x4b   : > { %3970 = vmatmul.mubr.msk.bf16.gmra.mrb[8].mxu0 %vm416_vm0, %v4639_v28 }
  0x4c   : > { %503 = vmatprep.mubr.bf16.mxu0 %v5328_v0  ;;  %1130 = vmatpush1.bf16.msra.mxu0 %v4671_v32 }
  0x4d   : > { %1131 = vmatprep.subr.bf16.mxu0 %v4679_v33  ;;  %1023 = vmatpush1.bf16.msra.mxu1 %v4692_v43 }
  0x4e   : > { %1024 = vmatprep.subr.bf16.mxu1 %v4693_v44 }
  0x50   : > { %1132 = vmatpush1.bf16.msra.mxu0 %v4677_v36 }
  0x51   : > { %1133 = vmatprep.subr.bf16.mxu0 %v4685_v38  ;;  %1025 = vmatpush1.bf16.msra.mxu1 %v4698_v48 }
  0x52   : > { %1026 = vmatprep.subr.bf16.mxu1 %v4699_v49 }
  0x53   : > { %3971 = vmatmul.mubr.msk.bf16.gmra.mrb[12].mxu0 %vm416_vm0, %v4640_v37 }
  0x54   : > { %513 = vmatprep.mubr.bf16.mxu0 %v5328_v0  ;;  %1134 = vmatpush1.bf16.msra.mxu0 %v4683_v41  ;;  %v4741_v41 = vld [vmem:[#allocation2] ss:$28 sps:$4 sm:$0xff]  }
  0x55   : > { %1135 = vmatprep.subr.bf16.mxu0 %v4691_v42  ;;  %1027 = vmatpush1.bf16.msra.mxu1 %v4704_v53  ;;  %v4744_v42 = vld [vmem:[#allocation2 + $0x8] ss:$28 sps:$4 sm:$0xff]   ;;  %v4750_v53 = vld [vmem:[#allocation2 + $0x40] ss:$28 sps:$4 sm:$0xff]  }
  0x56   : > { %1028 = vmatprep.subr.bf16.mxu1 %v4705_v54 }
  0x58   : > { %1136 = vmatpush1.bf16.msra.mxu0 %v4689_v45  ;;  %v4749_v45 = vld [vmem:[#allocation2 + $0x3c] ss:$28 sps:$4 sm:$0xff]  }
  0x59   : > { %1137 = vmatprep.subr.bf16.mxu0 %v4697_v47  ;;  %1029 = vmatpush1.bf16.msra.mxu1 %v4710_v56  ;;  %v4755_v56 = vld [vmem:[#allocation2 + $0x74] ss:$28 sps:$4 sm:$0xff]  }
  0x5a   : > { %1030 = vmatprep.subr.bf16.mxu1 %v4711_v58 }
  0x5b   : > { %3972 = vmatmul.mubr.msk.bf16.gmra.mrb[16].mxu0 %vm416_vm0, %v4641_v46  ;;  %v4752_v46 = vld [vmem:[#allocation2 + $0x44] ss:$28 sps:$4 sm:$0xff]  }
  0x5c   : > { %523 = vmatprep.mubr.bf16.mxu0 %v5328_v0  ;;  %1138 = vmatpush1.bf16.msra.mxu0 %v4695_v50 }
  0x5d   : > { %1139 = vmatprep.subr.bf16.mxu0 %v4703_v51  ;;  %1031 = vmatpush1.bf16.msra.mxu1 %v4716_v61 }
  0x5e   : > { %1032 = vmatprep.subr.bf16.mxu1 %v4717_v62 }
  0x60   : > { %1140 = vmatpush1.bf16.msra.mxu0 %v4701_v52  ;;  %v4747_v52 = vld [vmem:[#allocation2 + $0x38] ss:$28 sps:$4 sm:$0xff]  }
  0x61   : > { %1141 = vmatprep.subr.bf16.mxu0 %v4709_v55  ;;  %1033 = vmatpush1.bf16.msra.mxu1 %v4722_v2 }
  0x62   : > { %1034 = vmatprep.subr.bf16.mxu1 %v4723_v4  ;;  %v4761_v4 = vld [vmem:[#allocation2 + $0xac] ss:$28 sps:$4 sm:$0xff]  }
  0x63   : > { %3973 = vmatmul.mubr.msk.bf16.gmra.mrb[20].mxu0 %vm416_vm0, %v4642_v57  ;;  %v4758_v57 = vld [vmem:[#allocation2 + $0x7c] ss:$28 sps:$4 sm:$0xff]  }
  0x64   : > { %533 = vmatprep.mubr.bf16.mxu0 %v5328_v0  ;;  %1142 = vmatpush1.bf16.msra.mxu0 %v4707_v59 }
  0x65   : > { %1143 = vmatprep.subr.bf16.mxu0 %v4715_v60  ;;  %1035 = vmatpush1.bf16.msra.mxu1 %v4728_v9 }
  0x66   : > { %1036 = vmatprep.subr.bf16.mxu1 %v4729_v10 }
  0x68   : > { %1144 = vmatpush1.bf16.msra.mxu0 %v4713_v63  ;;  %v4753_v63 = vld [vmem:[#allocation2 + $0x70] ss:$28 sps:$4 sm:$0xff]  }
  0x69   : > { %1145 = vmatprep.subr.bf16.mxu0 %v4721_v1  ;;  %1037 = vmatpush1.bf16.msra.mxu1 %v4734_v12  ;;  %v4756_v1 = vld [vmem:[#allocation2 + $0x78] ss:$28 sps:$4 sm:$0xff]  }
  0x6a   : > { %1038 = vmatprep.subr.bf16.mxu1 %v4735_v13 }
  0x6b   : > { %3974 = vmatmul.mubr.msk.bf16.gmra.mrb[24].mxu0 %vm416_vm0, %v4643_v3 }
  0x6c   : > { %543 = vmatprep.mubr.bf16.mxu0 %v5328_v0  ;;  %1146 = vmatpush1.bf16.msra.mxu0 %v4719_v5  ;;  %v4731_v0 = vld [vmem:[%s6362_s3 + $0x1c8] ss:$16 sps:$4 sm:$0xff]   ;;  %v4764_v5 = vld [vmem:[#allocation2 + $0xb4] ss:$28 sps:$4 sm:$0xff]  }
  0x6d   : > { %1147 = vmatprep.subr.bf16.mxu0 %v4727_v6  ;;  %1039 = vmatpush1.bf16.msra.mxu1 %v4740_v16 }
  0x6e   : > { %2775 = vmatprep.subr.bf16.mxu1 %v4743_v17 }
  0x70   : > { %1148 = vmatpush1.bf16.msra.mxu0 %v4725_v7 }
  0x71   : > { %1149 = vmatprep.subr.bf16.mxu0 %v4733_v11  ;;  %v4759_v11 = vld [vmem:[#allocation2 + $0xa8] ss:$28 sps:$4 sm:$0xff]  }
  0x73   : > { %3975 = vmatmul.mubr.msk.bf16.gmra.mrb[28].mxu0 %vm416_vm0, %v4644_v8 }
  0x74   : > { %1150 = vmatpush1.bf16.msra.mxu0 %v4731_v0  ;;  %v4762_v0 = vld [vmem:[#allocation2 + $0xb0] ss:$28 sps:$4 sm:$0xff]  }
  0x75   : > { %1151 = vmatprep.subr.bf16.mxu0 %v4739_v14  ;;  %v4767_v14 = vld [vmem:[#allocation2 + $0xe4] ss:$28 sps:$4 sm:$0xff]  }
  0x78   : > { %1152 = vmatpush1.bf16.msra.mxu0 %v4737_v15  ;;  %v4770_v15 = vld [vmem:[#allocation2 + $0xec] ss:$28 sps:$4 sm:$0xff]  }
  0x79   : > { %3001 = vmatprep.subr.bf16.mxu0 %v4746_v18 }
 0x10e   : > { %v475_v26 = vpop.f32.mrb[0].mxu0 }
 0x10f   : > { %v476_v27 = vadd.f32 %v475_v26, %v5679_v24  ;;  %v477_v28 = vpop.f32.mrb[1].mxu0  ;;  %v4765_v26 = vld [vmem:[#allocation2 + $0xe0] ss:$28 sps:$4 sm:$0xff]  }
 0x110   : > { %v478_v29 = vadd.f32 %v477_v28, %v5682_v25  ;;  %v479_v30 = vpop.f32.mrb[2].mxu0 }
 0x111   : > { %v480_v31 = vadd.f32 %v479_v30, %v5679_v24  ;;  %v481_v32 = vpop.f32.mrb[3].mxu0  ;;  %v554_v34 = vmax.f32 %v476_v27, 0.0  ;;  %v4768_v27 = vld [vmem:[#allocation2 + $0xe8] ss:$28 sps:$4 sm:$0xff]   ;;  %v4773_v30 = vld [vmem:[#allocation2 + $0x11c] ss:$28 sps:$4 sm:$0xff]  }
 0x112   : > { %v482_v33 = vadd.f32 %v481_v32, %v5682_v25  ;;  %v555_v36 = vmax.f32 %v478_v29, 0.0 }
 0x113   : > { %v556_v35 = vmax.f32 %v480_v31, 0.0  ;;  %v4776_v31 = vld [vmem:[#allocation2 + $0x124] ss:$28 sps:$4 sm:$0xff]  }
 0x114   : > { %v557_v37 = vmax.f32 %v482_v33, 0.0 }
 0x115   : > { %v586_v38 = vpack.c.bf16 %v556_v35, %v554_v34 }
 0x116   : > { %v485_v39 = vpop.f32.mrb[4].mxu0  ;;  %v587_v40 = vpack.c.bf16 %v557_v37, %v555_v36  ;;  %v4771_v37 = vld [vmem:[#allocation2 + $0x118] ss:$28 sps:$4 sm:$0xff]  }
 0x117   : > { %v486_v43 = vadd.f32 %v485_v39, %v5679_v24  ;;  %v487_v44 = vpop.f32.mrb[5].mxu0 }
 0x118   : > { %v488_v47 = vadd.f32 %v487_v44, %v5682_v25  ;;  %v489_v48 = vpop.f32.mrb[6].mxu0  ;;  %1040 = vmatprep.mubr.bf16.mxu1 %v587_v40  ;;  %1153 = vmatprep.mubr.bf16.mxu0 %v587_v40 }
 0x119   : > { %v490_v49 = vadd.f32 %v489_v48, %v5679_v24  ;;  %v491_v50 = vpop.f32.mrb[7].mxu0  ;;  %1041 = vmatmul.mubr.bf16.vlgmr.msra.gmra.mrb[0].mxu1 %v586_v38  ;;  %1154 = vmatmul.mubr.bf16.vlgmr.msra.gmra.mrb[32].mxu0 %v586_v38  ;;  %v558_v54 = vmax.f32 %v486_v43, 0.0  ;;  %v4774_v38 = vld [vmem:[#allocation2 + $0x120] ss:$28 sps:$4 sm:$0xff]   ;;  %v4777_v48 = vld [vmem:[#allocation2 + $0x150] ss:$28 sps:$4 sm:$0xff]  }
 0x11a   : > { %v492_v51 = vadd.f32 %v491_v50, %v5682_v25  ;;  %2776 = vmatpush1.bf16.msra.mxu1 %v4741_v41  ;;  %3002 = vmatpush1.bf16.msra.mxu0 %v4744_v42  ;;  %v559_v58 = vmax.f32 %v488_v47, 0.0  ;;  %v4779_v41 = vld [vmem:[#allocation2 + $0x154] ss:$28 sps:$4 sm:$0xff]   ;;  %v4782_v42 = vld [vmem:[#allocation2 + $0x15c] ss:$28 sps:$4 sm:$0xff]  }
 0x11b   : > { %v560_v55 = vmax.f32 %v490_v49, 0.0  ;;  %2777 = vmatprep.subr.bf16.mxu1 %v4749_v45  ;;  %3003 = vmatprep.subr.bf16.mxu0 %v4752_v46  ;;  %v4780_v49 = vld [vmem:[#allocation2 + $0x158] ss:$28 sps:$4 sm:$0xff]  }
 0x11c   : > { %v561_v59 = vmax.f32 %v492_v51, 0.0 }
 0x11d   : > { %v588_v60 = vpack.c.bf16 %v560_v55, %v558_v54 }
 0x11e   : > { %v589_v61 = vpack.c.bf16 %v561_v59, %v559_v58  ;;  %v495_v62 = vpop.f32.mrb[8].mxu0  ;;  %2778 = vmatpush1.bf16.msra.mxu1 %v4747_v52  ;;  %3004 = vmatpush1.bf16.msra.mxu0 %v4750_v53  ;;  %v4785_v52 = vld [vmem:[#allocation2 + $0x18c] ss:$28 sps:$4 sm:$0xff]   ;;  %v4788_v53 = vld [vmem:[#allocation2 + $0x194] ss:$28 sps:$4 sm:$0xff]  }
 0x11f   : > { %v496_v2 = vadd.f32 %v495_v62, %v5679_v24  ;;  %v497_v3 = vpop.f32.mrb[9].mxu0  ;;  %2779 = vmatprep.subr.bf16.mxu1 %v4755_v56  ;;  %3005 = vmatprep.subr.bf16.mxu0 %v4758_v57  ;;  %v4783_v59 = vld [vmem:[#allocation2 + $0x188] ss:$28 sps:$4 sm:$0xff]  }
 0x120   : > { %v498_v6 = vadd.f32 %v497_v3, %v5682_v25  ;;  %v499_v7 = vpop.f32.mrb[10].mxu0  ;;  %1050 = vmatprep.mubr.bf16.mxu1 %v589_v61  ;;  %1163 = vmatprep.mubr.bf16.mxu0 %v589_v61 }
 0x121   : > { %v500_v8 = vadd.f32 %v499_v7, %v5679_v24  ;;  %v501_v9 = vpop.f32.mrb[11].mxu0  ;;  %1051 = vmatmul.mubr.bf16.gmra.mrb[4].mxu1 %v588_v60  ;;  %1164 = vmatmul.mubr.bf16.gmra.mrb[36].mxu0 %v588_v60  ;;  %v562_v12 = vmax.f32 %v496_v2, 0.0  ;;  %v4786_v60 = vld [vmem:[#allocation2 + $0x190] ss:$28 sps:$4 sm:$0xff]   ;;  %v4789_v7 = vld [vmem:[#allocation2 + $0x1c0] ss:$28 sps:$4 sm:$0xff]  }
 0x122   : > { %v502_v10 = vadd.f32 %v501_v9, %v5682_v25  ;;  %2780 = vmatpush1.bf16.msra.mxu1 %v4753_v63  ;;  %3006 = vmatpush1.bf16.msra.mxu0 %v4756_v1  ;;  %v563_v16 = vmax.f32 %v498_v6, 0.0  ;;  %v4791_v63 = vld [vmem:[#allocation2 + $0x1c4] ss:$28 sps:$4 sm:$0xff]   ;;  %v4794_v1 = vld [vmem:[#allocation2 + $0x1cc] ss:$28 sps:$4 sm:$0xff]  }
 0x123   : > { %v564_v13 = vmax.f32 %v500_v8, 0.0  ;;  %2781 = vmatprep.subr.bf16.mxu1 %v4761_v4  ;;  %3007 = vmatprep.subr.bf16.mxu0 %v4764_v5  ;;  %v4792_v8 = vld [vmem:[#allocation2 + $0x1c8] ss:$28 sps:$4 sm:$0xff]  }
 0x124   : > { %v565_v17 = vmax.f32 %v502_v10, 0.0 }
 0x125   : > { %v590_v18 = vpack.c.bf16 %v564_v13, %v562_v12 }
 0x126   : > { %v591_v19 = vpack.c.bf16 %v565_v17, %v563_v16  ;;  %v505_v22 = vpop.f32.mrb[12].mxu0  ;;  %2782 = vmatpush1.bf16.msra.mxu1 %v4759_v11  ;;  %3008 = vmatpush1.bf16.msra.mxu0 %v4762_v0  ;;  %v4797_v11 = vld [vmem:[#allocation2 + $0x1fc] ss:$28 sps:$4 sm:$0xff]   ;;  %v4800_v0 = vld [vmem:[#allocation2 + $0x204] ss:$28 sps:$4 sm:$0xff]  }
 0x127   : > { %v506_v28 = vadd.f32 %v505_v22, %v5679_v24  ;;  %v507_v29 = vpop.f32.mrb[13].mxu0  ;;  %2783 = vmatprep.subr.bf16.mxu1 %v4767_v14  ;;  %3009 = vmatprep.subr.bf16.mxu0 %v4770_v15  ;;  %v4795_v17 = vld [vmem:[#allocation2 + $0x1f8] ss:$28 sps:$4 sm:$0xff]  }
 0x128   : > { %v508_v32 = vadd.f32 %v507_v29, %v5682_v25  ;;  %v509_v33 = vpop.f32.mrb[14].mxu0  ;;  %1060 = vmatprep.mubr.bf16.mxu1 %v591_v19  ;;  %1173 = vmatprep.mubr.bf16.mxu0 %v591_v19 }
 0x129   : > { %v510_v34 = vadd.f32 %v509_v33, %v5679_v24  ;;  %v511_v35 = vpop.f32.mrb[15].mxu0  ;;  %1061 = vmatmul.mubr.bf16.gmra.mrb[8].mxu1 %v590_v18  ;;  %1174 = vmatmul.mubr.bf16.gmra.mrb[40].mxu0 %v590_v18  ;;  %v566_v39 = vmax.f32 %v506_v28, 0.0  ;;  %v4798_v18 = vld [vmem:[#allocation2 + $0x200] ss:$28 sps:$4 sm:$0xff]   ;;  %v4801_v33 = vld [vmem:[#allocation2 + $0x230] ss:$28 sps:$4 sm:$0xff]  }
 0x12a   : > { %v512_v36 = vadd.f32 %v511_v35, %v5682_v25  ;;  %2784 = vmatpush1.bf16.msra.mxu1 %v4765_v26  ;;  %3010 = vmatpush1.bf16.msra.mxu0 %v4768_v27  ;;  %v567_v43 = vmax.f32 %v508_v32, 0.0  ;;  %v4803_v26 = vld [vmem:[#allocation2 + $0x234] ss:$28 sps:$4 sm:$0xff]   ;;  %v4806_v27 = vld [vmem:[#allocation2 + $0x23c] ss:$28 sps:$4 sm:$0xff]  }
 0x12b   : > { %v568_v40 = vmax.f32 %v510_v34, 0.0  ;;  %2785 = vmatprep.subr.bf16.mxu1 %v4773_v30  ;;  %3011 = vmatprep.subr.bf16.mxu0 %v4776_v31  ;;  %v4804_v34 = vld [vmem:[#allocation2 + $0x238] ss:$28 sps:$4 sm:$0xff]  }
 0x12c   : > { %v569_v44 = vmax.f32 %v512_v36, 0.0 }
 0x12d   : > { %v592_v45 = vpack.c.bf16 %v568_v40, %v566_v39 }
 0x12e   : > { %v593_v46 = vpack.c.bf16 %v569_v44, %v567_v43  ;;  %v515_v47 = vpop.f32.mrb[16].mxu0  ;;  %2786 = vmatpush1.bf16.msra.mxu1 %v4771_v37  ;;  %3012 = vmatpush1.bf16.msra.mxu0 %v4774_v38  ;;  %v4809_v37 = vld [vmem:[#allocation2 + $0x26c] ss:$28 sps:$4 sm:$0xff]   ;;  %v4812_v38 = vld [vmem:[#allocation2 + $0x274] ss:$28 sps:$4 sm:$0xff]  }
 0x12f   : > { %v516_v50 = vadd.f32 %v515_v47, %v5679_v24  ;;  %v517_v51 = vpop.f32.mrb[17].mxu0  ;;  %2787 = vmatprep.subr.bf16.mxu1 %v4779_v41  ;;  %3013 = vmatprep.subr.bf16.mxu0 %v4782_v42  ;;  %v4807_v44 = vld [vmem:[#allocation2 + $0x268] ss:$28 sps:$4 sm:$0xff]  }
 0x130   : > { %v518_v54 = vadd.f32 %v517_v51, %v5682_v25  ;;  %v519_v55 = vpop.f32.mrb[18].mxu0  ;;  %1070 = vmatprep.mubr.bf16.mxu1 %v593_v46  ;;  %1183 = vmatprep.mubr.bf16.mxu0 %v593_v46 }
 0x131   : > { %v520_v56 = vadd.f32 %v519_v55, %v5679_v24  ;;  %v521_v57 = vpop.f32.mrb[19].mxu0  ;;  %1071 = vmatmul.mubr.bf16.gmra.mrb[12].mxu1 %v592_v45  ;;  %1184 = vmatmul.mubr.bf16.gmra.mrb[44].mxu0 %v592_v45  ;;  %v570_v61 = vmax.f32 %v516_v50, 0.0  ;;  %v4810_v45 = vld [vmem:[#allocation2 + $0x270] ss:$28 sps:$4 sm:$0xff]   ;;  %v4813_v55 = vld [vmem:[#allocation2 + $0x2a0] ss:$28 sps:$4 sm:$0xff]  }
 0x132   : > { %v522_v58 = vadd.f32 %v521_v57, %v5682_v25  ;;  %2788 = vmatpush1.bf16.msra.mxu1 %v4777_v48  ;;  %3014 = vmatpush1.bf16.msra.mxu0 %v4780_v49  ;;  %v571_v2 = vmax.f32 %v518_v54, 0.0  ;;  %v4815_v48 = vld [vmem:[#allocation2 + $0x2a4] ss:$28 sps:$4 sm:$0xff]   ;;  %v4818_v49 = vld [vmem:[#allocation2 + $0x2ac] ss:$28 sps:$4 sm:$0xff]  }
 0x133   : > { %v572_v62 = vmax.f32 %v520_v56, 0.0  ;;  %2789 = vmatprep.subr.bf16.mxu1 %v4785_v52  ;;  %3015 = vmatprep.subr.bf16.mxu0 %v4788_v53  ;;  %v4816_v56 = vld [vmem:[#allocation2 + $0x2a8] ss:$28 sps:$4 sm:$0xff]  }
 0x134   : > { %v573_v3 = vmax.f32 %v522_v58, 0.0 }
 0x135   : > { %v594_v4 = vpack.c.bf16 %v572_v62, %v570_v61 }
 0x136   : > { %v595_v5 = vpack.c.bf16 %v573_v3, %v571_v2  ;;  %v525_v6 = vpop.f32.mrb[20].mxu0  ;;  %2790 = vmatpush1.bf16.msra.mxu1 %v4783_v59  ;;  %3016 = vmatpush1.bf16.msra.mxu0 %v4786_v60  ;;  %v4821_v59 = vld [vmem:[#allocation2 + $0x2dc] ss:$28 sps:$4 sm:$0xff]   ;;  %v4824_v60 = vld [vmem:[#allocation2 + $0x2e4] ss:$28 sps:$4 sm:$0xff]  }
 0x137   : > { %v526_v9 = vadd.f32 %v525_v6, %v5679_v24  ;;  %v527_v10 = vpop.f32.mrb[21].mxu0  ;;  %2791 = vmatprep.subr.bf16.mxu1 %v4791_v63  ;;  %3017 = vmatprep.subr.bf16.mxu0 %v4794_v1  ;;  %v4819_v3 = vld [vmem:[#allocation2 + $0x2d8] ss:$28 sps:$4 sm:$0xff]  }
 0x138   : > { %v528_v12 = vadd.f32 %v527_v10, %v5682_v25  ;;  %v529_v13 = vpop.f32.mrb[22].mxu0  ;;  %1080 = vmatprep.mubr.bf16.mxu1 %v595_v5  ;;  %1193 = vmatprep.mubr.bf16.mxu0 %v595_v5 }
 0x139   : > { %v530_v14 = vadd.f32 %v529_v13, %v5679_v24  ;;  %v531_v15 = vpop.f32.mrb[23].mxu0  ;;  %1081 = vmatmul.mubr.bf16.gmra.mrb[16].mxu1 %v594_v4  ;;  %1194 = vmatmul.mubr.bf16.gmra.mrb[48].mxu0 %v594_v4  ;;  %v574_v19 = vmax.f32 %v526_v9, 0.0  ;;  %v4822_v4 = vld [vmem:[#allocation2 + $0x2e0] ss:$28 sps:$4 sm:$0xff]   ;;  %v4836_v13 = vld [vmem:[#allocation2 + $0x354] ss:$28 sps:$4 sm:$0xff]  }
 0x13a   : > { %v532_v16 = vadd.f32 %v531_v15, %v5682_v25  ;;  %2792 = vmatpush1.bf16.msra.mxu1 %v4789_v7  ;;  %3018 = vmatpush1.bf16.msra.mxu0 %v4792_v8  ;;  %v575_v28 = vmax.f32 %v528_v12, 0.0  ;;  %v4833_v12 = vld [vmem:[#allocation2 + $0x34c] ss:$28 sps:$4 sm:$0xff]  }
 0x13b   : > { %v576_v22 = vmax.f32 %v530_v14, 0.0  ;;  %2793 = vmatprep.subr.bf16.mxu1 %v4797_v11  ;;  %3019 = vmatprep.subr.bf16.mxu0 %v4800_v0  ;;  %v4825_v11 = vld [vmem:[#allocation2 + $0x310] ss:$28 sps:$4 sm:$0xff]   ;;  %v4828_v0 = vld [vmem:[#allocation2 + $0x318] ss:$28 sps:$4 sm:$0xff]  }
 0x13c   : > { %v577_v29 = vmax.f32 %v532_v16, 0.0  ;;  %v4831_v14 = vld [vmem:[#allocation2 + $0x348] ss:$28 sps:$4 sm:$0xff]   ;;  %v4834_v15 = vld [vmem:[#allocation2 + $0x350] ss:$28 sps:$4 sm:$0xff]  }
 0x13d   : > { %v596_v30 = vpack.c.bf16 %v576_v22, %v574_v19  ;;  %v4839_v16 = vld [vmem:[#allocation2 + $0x384] ss:$28 sps:$4 sm:$0xff]   ;;  %v682_v22 = vsub.s32 3, %v5667_v20 }
 0x13e   : > { %v597_v31 = vpack.c.bf16 %v577_v29, %v575_v28  ;;  %v535_v32 = vpop.f32.mrb[24].mxu0  ;;  %2794 = vmatpush1.bf16.msra.mxu1 %v4795_v17  ;;  %3020 = vmatpush1.bf16.msra.mxu0 %v4798_v18  ;;  %v4842_v17 = vld [vmem:[#allocation2 + $0x38c] ss:$28 sps:$4 sm:$0xff]   ;;  %v678_v18 = vsub.s32 2, %v5667_v20  ;;  %v666_v19 = vld [vmem:[%s6363_s4] sm:$0xf] }
 0x13f   : > { %v536_v35 = vadd.f32 %v535_v32, %v5679_v24  ;;  %v537_v36 = vpop.f32.mrb[25].mxu0  ;;  %2795 = vmatprep.subr.bf16.mxu1 %v4803_v26  ;;  %3021 = vmatprep.subr.bf16.mxu0 %v4806_v27  ;;  %v5722_v26 = vrot.slane %v666_v19, %v5670_v21  ;;  %v5729_v28 = vrot.slane %v666_v19, %v5676_v23 }
 0x140   : > { %v538_v39 = vadd.f32 %v537_v36, %v5682_v25  ;;  %v539_v40 = vpop.f32.mrb[26].mxu0  ;;  %1090 = vmatprep.mubr.bf16.mxu1 %v597_v31  ;;  %1203 = vmatprep.mubr.bf16.mxu0 %v597_v31  ;;  %v5726_v27 = vrot.slane %v666_v19, %v678_v18  ;;  %v5733_v29 = vrot.slane %v666_v19, %v682_v22 }
 0x141   : > { %v540_v41 = vadd.f32 %v539_v40, %v5679_v24  ;;  %v541_v42 = vpop.f32.mrb[27].mxu0  ;;  %1091 = vmatmul.mubr.bf16.gmra.mrb[20].mxu1 %v596_v30  ;;  %1204 = vmatmul.mubr.bf16.gmra.mrb[52].mxu0 %v596_v30  ;;  %v578_v46 = vmax.f32 %v536_v35, 0.0 }
 0x142   : > { %v542_v43 = vadd.f32 %v541_v42, %v5682_v25  ;;  %2796 = vmatpush1.bf16.msra.mxu1 %v4801_v33  ;;  %3022 = vmatpush1.bf16.msra.mxu0 %v4804_v34  ;;  %v579_v50 = vmax.f32 %v538_v39, 0.0 }
 0x143   : > { %v580_v47 = vmax.f32 %v540_v41, 0.0  ;;  %2797 = vmatprep.subr.bf16.mxu1 %v4809_v37  ;;  %3023 = vmatprep.subr.bf16.mxu0 %v4812_v38 }
 0x144   : > { %v581_v51 = vmax.f32 %v542_v43, 0.0 }
 0x145   : > { %v598_v52 = vpack.c.bf16 %v580_v47, %v578_v46 }
 0x146   : > { %v599_v53 = vpack.c.bf16 %v581_v51, %v579_v50  ;;  %v545_v54 = vpop.f32.mrb[28].mxu0  ;;  %2798 = vmatpush1.bf16.msra.mxu1 %v4807_v44  ;;  %3024 = vmatpush1.bf16.msra.mxu0 %v4810_v45 }
 0x147   : > { %v546_v57 = vadd.f32 %v545_v54, %v5679_v24  ;;  %v547_v58 = vpop.f32.mrb[29].mxu0  ;;  %2799 = vmatprep.subr.bf16.mxu1 %v4815_v48  ;;  %3025 = vmatprep.subr.bf16.mxu0 %v4818_v49 }
 0x148   : > { %v548_v61 = vadd.f32 %v547_v58, %v5682_v25  ;;  %v549_v62 = vpop.f32.mrb[30].mxu0  ;;  %1100 = vmatprep.mubr.bf16.mxu1 %v599_v53  ;;  %1213 = vmatprep.mubr.bf16.mxu0 %v599_v53 }
 0x149   : > { %v550_v63 = vadd.f32 %v549_v62, %v5679_v24  ;;  %v551_v1 = vpop.f32.mrb[31].mxu0  ;;  %1101 = vmatmul.mubr.bf16.gmra.mrb[24].mxu1 %v598_v52  ;;  %1214 = vmatmul.mubr.bf16.gmra.mrb[56].mxu0 %v598_v52  ;;  %v582_v5 = vmax.f32 %v546_v57, 0.0  ;;  %v4827_v24 = vld [vmem:[#allocation2 + $0x314] ss:$28 sps:$4 sm:$0xff]  }
 0x14a   : > { %v552_v2 = vadd.f32 %v551_v1, %v5682_v25  ;;  %2800 = vmatpush1.bf16.msra.mxu1 %v4813_v55  ;;  %3026 = vmatpush1.bf16.msra.mxu0 %v4816_v56  ;;  %v583_v7 = vmax.f32 %v548_v61, 0.0  ;;  %v4830_v25 = vld [vmem:[#allocation2 + $0x31c] ss:$28 sps:$4 sm:$0xff]   ;;  %v4840_v61 = vld [vmem:[#allocation2 + $0x388] ss:$28 sps:$4 sm:$0xff]  }
 0x14b   : > { %v584_v6 = vmax.f32 %v550_v63, 0.0  ;;  %2801 = vmatprep.subr.bf16.mxu1 %v4821_v59  ;;  %3027 = vmatprep.subr.bf16.mxu0 %v4824_v60  ;;  %v4837_v60 = vld [vmem:[#allocation2 + $0x380] ss:$28 sps:$4 sm:$0xff]  }
 0x14c   : > { %v585_v8 = vmax.f32 %v552_v2, 0.0 }
 0x14d   : > { %v600_v9 = vpack.c.bf16 %v584_v6, %v582_v5 }
 0x14e   : > { %v601_v10 = vpack.c.bf16 %v585_v8, %v583_v7  ;;  %2802 = vmatpush1.bf16.msra.mxu1 %v4819_v3  ;;  %3028 = vmatpush1.bf16.msra.mxu0 %v4822_v4  ;;  %v4845_v3 = vld [vmem:[#allocation2 + $0x3bc] ss:$28 sps:$4 sm:$0xff]   ;;  %v4848_v4 = vld [vmem:[#allocation2 + $0x3c4] ss:$28 sps:$4 sm:$0xff]  }
 0x14f   : > { %2803 = vmatprep.subr.bf16.mxu1 %v4827_v24  ;;  %3029 = vmatprep.subr.bf16.mxu0 %v4830_v25 }
 0x150   : > { %1110 = vmatprep.mubr.bf16.mxu1 %v601_v10  ;;  %1223 = vmatprep.mubr.bf16.mxu0 %v601_v10 }
 0x151   : > { %1111 = vmatmul.mubr.bf16.gmra.mrb[28].mxu1 %v600_v9  ;;  %1224 = vmatmul.mubr.bf16.gmra.mrb[60].mxu0 %v600_v9 }
 0x152   : > { %2804 = vmatpush1.bf16.msra.mxu1 %v4825_v11  ;;  %3030 = vmatpush1.bf16.msra.mxu0 %v4828_v0 }
 0x153   : > { %2805 = vmatprep.subr.bf16.mxu1 %v4833_v12  ;;  %3031 = vmatprep.subr.bf16.mxu0 %v4836_v13  ;;  %v4843_v12 = vld [vmem:[#allocation2 + $0x3b8] ss:$28 sps:$4 sm:$0xff]   ;;  %v4846_v13 = vld [vmem:[#allocation2 + $0x3c0] ss:$28 sps:$4 sm:$0xff]  }
 0x156   : > { %2806 = vmatpush1.bf16.msra.mxu1 %v4831_v14  ;;  %3032 = vmatpush1.bf16.msra.mxu0 %v4834_v15  ;;  %v4851_v14 = vld [vmem:[#allocation2 + $0x3f4] ss:$28 sps:$4 sm:$0xff]  }
 0x157   : > { %2888 = vmatprep.subr.bf16.mxu1 %v4839_v16  ;;  %3114 = vmatprep.subr.bf16.mxu0 %v4842_v17 }
 0x1ec   : > { %v1042_v30 = vpop.f32.mrb[0].mxu1  ;;  %v1155_v31 = vpop.f32.mrb[32].mxu0 }
 0x1ed   : > { %v1043_v32 = vadd.f32 %v1042_v30, %v5722_v26  ;;  %v1156_v33 = vadd.f32 %v1155_v31, %v5726_v27  ;;  %v1044_v34 = vpop.f32.mrb[1].mxu1  ;;  %v1157_v35 = vpop.f32.mrb[33].mxu0  ;;  %v4854_v30 = vld [vmem:[#allocation2 + $0x3fc] ss:$28 sps:$4 sm:$0xff]  }
 0x1ee   : > { %v1045_v36 = vadd.f32 %v1044_v34, %v5729_v28  ;;  %v1158_v37 = vadd.f32 %v1157_v35, %v5733_v29  ;;  %v1046_v38 = vpop.f32.mrb[2].mxu1  ;;  %v1159_v39 = vpop.f32.mrb[34].mxu0 }
 0x1ef   : > { %v1047_v40 = vadd.f32 %v1046_v38, %v5722_v26  ;;  %v1160_v41 = vadd.f32 %v1159_v39, %v5726_v27  ;;  %v1048_v42 = vpop.f32.mrb[3].mxu1  ;;  %v1161_v43 = vpop.f32.mrb[35].mxu0  ;;  %v1234_v46 = vmax.f32 %v1043_v32, 0.0  ;;  %v1236_v47 = vmax.f32 %v1156_v33, 0.0 }
 0x1f0   : > { %v1049_v44 = vadd.f32 %v1048_v42, %v5729_v28  ;;  %v1162_v45 = vadd.f32 %v1161_v43, %v5733_v29  ;;  %v1235_v50 = vmax.f32 %v1045_v36, 0.0  ;;  %v1237_v51 = vmax.f32 %v1158_v37, 0.0  ;;  %v4852_v42 = vld [vmem:[#allocation2 + $0x3f8] ss:$28 sps:$4 sm:$0xff]  }
 0x1f1   : > { %v1238_v48 = vmax.f32 %v1047_v40, 0.0  ;;  %v1240_v49 = vmax.f32 %v1160_v41, 0.0  ;;  %v4849_v41 = vld [vmem:[#allocation2 + $0x3f0] ss:$28 sps:$4 sm:$0xff]  }
 0x1f2   : > { %v1239_v52 = vmax.f32 %v1049_v44, 0.0  ;;  %v1241_v53 = vmax.f32 %v1162_v45, 0.0 }
 0x1f3   : > { %v5743_v54 = vpack.c.bf16 %v1238_v48, %v1234_v46  ;;  %v5745_v55 = vpack.c.bf16 %v1240_v49, %v1236_v47  ;;  %v4857_v47 = vld [vmem:[#allocation2 + $0x42c] ss:$28 sps:$4 sm:$0xff]   ;;  %v4860_v48 = vld [vmem:[#allocation2 + $0x434] ss:$28 sps:$4 sm:$0xff]  }
 0x1f4   : > { %v5747_v56 = vpack.c.bf16 %v1239_v52, %v1235_v50  ;;  %v5749_v57 = vpack.c.bf16 %v1241_v53, %v1237_v51  ;;  %v1052_v58 = vpop.f32.mrb[4].mxu1  ;;  %v1165_v59 = vpop.f32.mrb[36].mxu0 }
 0x1f5   : > { %v1053_v62 = vadd.f32 %v1052_v58, %v5722_v26  ;;  %v1166_v63 = vadd.f32 %v1165_v59, %v5726_v27  ;;  %v1054_v1 = vpop.f32.mrb[5].mxu1  ;;  %v1167_v2 = vpop.f32.mrb[37].mxu0 }
 0x1f6   : > { %v1055_v5 = vadd.f32 %v1054_v1, %v5729_v28  ;;  %v1168_v6 = vadd.f32 %v1167_v2, %v5733_v29  ;;  %v1056_v7 = vpop.f32.mrb[6].mxu1  ;;  %v1169_v8 = vpop.f32.mrb[38].mxu0  ;;  %2807 = vmatprep.mubr.bf16.mxu1 %v5747_v56  ;;  %3033 = vmatprep.mubr.bf16.mxu0 %v5747_v56  ;;  %v4858_v1 = vld [vmem:[#allocation2 + $0x430] ss:$28 sps:$4 sm:$0xff]   ;;  %v4863_v2 = vld [vmem:[#allocation2 + $0x464] ss:$28 sps:$4 sm:$0xff]  }
 0x1f7   : > { %v1057_v9 = vadd.f32 %v1056_v7, %v5722_v26  ;;  %v1170_v10 = vadd.f32 %v1169_v8, %v5726_v27  ;;  %v1058_v24 = vpop.f32.mrb[7].mxu1  ;;  %v1171_v25 = vpop.f32.mrb[39].mxu0  ;;  %2808 = vmatmul.mubr.bf16.vlgmr.msra.gmra.mrb[32].mxu1 %v5743_v54  ;;  %3034 = vmatmul.mubr.bf16.vlgmr.msra.gmra.mrb[64].mxu0 %v5743_v54  ;;  %v1242_v15 = vmax.f32 %v1053_v62, 0.0  ;;  %v1244_v16 = vmax.f32 %v1166_v63, 0.0  ;;  %v4855_v63 = vld [vmem:[#allocation2 + $0x428] ss:$28 sps:$4 sm:$0xff]  }
 0x1f8   : > { %v1059_v11 = vadd.f32 %v1058_v24, %v5729_v28  ;;  %v1172_v0 = vadd.f32 %v1171_v25, %v5733_v29  ;;  %2889 = vmatpush1.bf16.msra.mxu1 %v4837_v60  ;;  %3115 = vmatpush1.bf16.msra.mxu0 %v4840_v61  ;;  %v1243_v31 = vmax.f32 %v1055_v5, 0.0  ;;  %v1245_v32 = vmax.f32 %v1168_v6, 0.0  ;;  %v4866_v7 = vld [vmem:[#allocation2 + $0x46c] ss:$28 sps:$4 sm:$0xff]  }
 0x1f9   : > { %v1246_v17 = vmax.f32 %v1057_v9, 0.0  ;;  %v1248_v19 = vmax.f32 %v1170_v10, 0.0  ;;  %2890 = vmatprep.subr.bf16.mxu1 %v4845_v3  ;;  %3116 = vmatprep.subr.bf16.mxu0 %v4848_v4 }
 0x1fa   : > { %v1247_v33 = vmax.f32 %v1059_v11, 0.0  ;;  %v1249_v34 = vmax.f32 %v1172_v0, 0.0 }
 0x1fb   : > { %v5763_v35 = vpack.c.bf16 %v1246_v17, %v1242_v15  ;;  %v5765_v36 = vpack.c.bf16 %v1248_v19, %v1244_v16  ;;  %v4861_v15 = vld [vmem:[#allocation2 + $0x460] ss:$28 sps:$4 sm:$0xff]   ;;  %v4864_v16 = vld [vmem:[#allocation2 + $0x468] ss:$28 sps:$4 sm:$0xff]  }
 0x1fc   : > { %v5767_v37 = vpack.c.bf16 %v1247_v33, %v1243_v31  ;;  %v5769_v38 = vpack.c.bf16 %v1249_v34, %v1245_v32  ;;  %2891 = vmatpush1.bf16.msra.mxu1 %v4843_v12  ;;  %v1062_v39 = vpop.f32.mrb[8].mxu1  ;;  %v1175_v40 = vpop.f32.mrb[40].mxu0  ;;  %3117 = vmatpush1.bf16.msra.mxu0 %v4846_v13  ;;  %v4869_v32 = vld [vmem:[#allocation2 + $0x49c] ss:$28 sps:$4 sm:$0xff]   ;;  %v4872_v33 = vld [vmem:[#allocation2 + $0x4a4] ss:$28 sps:$4 sm:$0xff]  }
 0x1fd   : > { %v1063_v43 = vadd.f32 %v1062_v39, %v5722_v26  ;;  %v1176_v44 = vadd.f32 %v1175_v40, %v5726_v27  ;;  %v1064_v45 = vpop.f32.mrb[9].mxu1  ;;  %v1177_v46 = vpop.f32.mrb[41].mxu0  ;;  %2892 = vmatprep.subr.bf16.mxu1 %v4851_v14  ;;  %3118 = vmatprep.subr.bf16.mxu0 %v4854_v30 }
 0x1fe   : > { %v1065_v49 = vadd.f32 %v1064_v45, %v5729_v28  ;;  %v1178_v50 = vadd.f32 %v1177_v46, %v5733_v29  ;;  %v1066_v51 = vpop.f32.mrb[10].mxu1  ;;  %v1179_v52 = vpop.f32.mrb[42].mxu0  ;;  %2817 = vmatprep.mubr.bf16.mxu1 %v5767_v37  ;;  %3043 = vmatprep.mubr.bf16.mxu0 %v5767_v37 }
 0x1ff   : > { %v1067_v53 = vadd.f32 %v1066_v51, %v5722_v26  ;;  %v1180_v58 = vadd.f32 %v1179_v52, %v5726_v27  ;;  %v1068_v59 = vpop.f32.mrb[11].mxu1  ;;  %v1181_v60 = vpop.f32.mrb[43].mxu0  ;;  %2818 = vmatmul.mubr.bf16.gmra.mrb[36].mxu1 %v5763_v35  ;;  %3044 = vmatmul.mubr.bf16.gmra.mrb[68].mxu0 %v5763_v35  ;;  %v1250_v3 = vmax.f32 %v1063_v43, 0.0  ;;  %v1252_v4 = vmax.f32 %v1176_v44, 0.0 }
 0x200   : > { %v1069_v61 = vadd.f32 %v1068_v59, %v5729_v28  ;;  %v1182_v62 = vadd.f32 %v1181_v60, %v5733_v29  ;;  %2893 = vmatpush1.bf16.msra.mxu1 %v4849_v41  ;;  %3119 = vmatpush1.bf16.msra.mxu0 %v4852_v42  ;;  %v1251_v8 = vmax.f32 %v1065_v49, 0.0  ;;  %v1253_v9 = vmax.f32 %v1178_v50, 0.0  ;;  %v4870_v49 = vld [vmem:[#allocation2 + $0x4a0] ss:$28 sps:$4 sm:$0xff]   ;;  %v4875_v50 = vld [vmem:[#allocation2 + $0x4d4] ss:$28 sps:$4 sm:$0xff]  }
 0x201   : > { %v1254_v5 = vmax.f32 %v1067_v53, 0.0  ;;  %v1256_v6 = vmax.f32 %v1180_v58, 0.0  ;;  %2894 = vmatprep.subr.bf16.mxu1 %v4857_v47  ;;  %3120 = vmatprep.subr.bf16.mxu0 %v4860_v48  ;;  %v4867_v48 = vld [vmem:[#allocation2 + $0x498] ss:$28 sps:$4 sm:$0xff]  }
 0x202   : > { %v1255_v10 = vmax.f32 %v1069_v61, 0.0  ;;  %v1257_v24 = vmax.f32 %v1182_v62, 0.0  ;;  %v4878_v59 = vld [vmem:[#allocation2 + $0x4dc] ss:$28 sps:$4 sm:$0xff]  }
 0x203   : > { %v5783_v25 = vpack.c.bf16 %v1254_v5, %v1250_v3  ;;  %v5785_v11 = vpack.c.bf16 %v1256_v6, %v1252_v4 }
 0x204   : > { %v5787_v0 = vpack.c.bf16 %v1255_v10, %v1251_v8  ;;  %v5789_v12 = vpack.c.bf16 %v1257_v24, %v1253_v9  ;;  %2895 = vmatpush1.bf16.msra.mxu1 %v4855_v63  ;;  %v1072_v13 = vpop.f32.mrb[12].mxu1  ;;  %v1185_v14 = vpop.f32.mrb[44].mxu0  ;;  %3121 = vmatpush1.bf16.msra.mxu0 %v4858_v1  ;;  %v4876_v8 = vld [vmem:[#allocation2 + $0x4d8] ss:$28 sps:$4 sm:$0xff]  }
 0x205   : > { %v1073_v17 = vadd.f32 %v1072_v13, %v5722_v26  ;;  %v1186_v19 = vadd.f32 %v1185_v14, %v5726_v27  ;;  %v1074_v30 = vpop.f32.mrb[13].mxu1  ;;  %v1187_v31 = vpop.f32.mrb[45].mxu0  ;;  %2896 = vmatprep.subr.bf16.mxu1 %v4863_v2  ;;  %3122 = vmatprep.subr.bf16.mxu0 %v4866_v7  ;;  %v4873_v7 = vld [vmem:[#allocation2 + $0x4d0] ss:$28 sps:$4 sm:$0xff]  }
 0x206   : > { %v1075_v34 = vadd.f32 %v1074_v30, %v5729_v28  ;;  %v1188_v39 = vadd.f32 %v1187_v31, %v5733_v29  ;;  %v1076_v40 = vpop.f32.mrb[14].mxu1  ;;  %v1189_v41 = vpop.f32.mrb[46].mxu0  ;;  %2827 = vmatprep.mubr.bf16.mxu1 %v5787_v0  ;;  %3053 = vmatprep.mubr.bf16.mxu0 %v5787_v0  ;;  %v4881_v14 = vld [vmem:[#allocation2 + $0x50c] ss:$28 sps:$4 sm:$0xff]  }
 0x207   : > { %v1077_v42 = vadd.f32 %v1076_v40, %v5722_v26  ;;  %v1190_v43 = vadd.f32 %v1189_v41, %v5726_v27  ;;  %v1078_v44 = vpop.f32.mrb[15].mxu1  ;;  %v1191_v45 = vpop.f32.mrb[47].mxu0  ;;  %2828 = vmatmul.mubr.bf16.gmra.mrb[40].mxu1 %v5783_v25  ;;  %3054 = vmatmul.mubr.bf16.gmra.mrb[72].mxu0 %v5783_v25  ;;  %v1258_v51 = vmax.f32 %v1073_v17, 0.0  ;;  %v1260_v52 = vmax.f32 %v1186_v19, 0.0  ;;  %v4879_v41 = vld [vmem:[#allocation2 + $0x508] ss:$28 sps:$4 sm:$0xff]  }
 0x208   : > { %v1079_v46 = vadd.f32 %v1078_v44, %v5729_v28  ;;  %v1192_v47 = vadd.f32 %v1191_v45, %v5733_v29  ;;  %2897 = vmatpush1.bf16.msra.mxu1 %v4861_v15  ;;  %3123 = vmatpush1.bf16.msra.mxu0 %v4864_v16  ;;  %v1259_v60 = vmax.f32 %v1075_v34, 0.0  ;;  %v1261_v61 = vmax.f32 %v1188_v39, 0.0  ;;  %v4884_v15 = vld [vmem:[#allocation2 + $0x514] ss:$28 sps:$4 sm:$0xff]  }
 0x209   : > { %v1262_v53 = vmax.f32 %v1077_v42, 0.0  ;;  %v1264_v58 = vmax.f32 %v1190_v43, 0.0  ;;  %2898 = vmatprep.subr.bf16.mxu1 %v4869_v32  ;;  %3124 = vmatprep.subr.bf16.mxu0 %v4872_v33  ;;  %v4882_v42 = vld [vmem:[#allocation2 + $0x510] ss:$28 sps:$4 sm:$0xff]   ;;  %v4887_v43 = vld [vmem:[#allocation2 + $0x544] ss:$28 sps:$4 sm:$0xff]  }
 0x20a   : > { %v1263_v62 = vmax.f32 %v1079_v46, 0.0  ;;  %v1265_v63 = vmax.f32 %v1192_v47, 0.0 }
 0x20b   : > { %v5803_v1 = vpack.c.bf16 %v1262_v53, %v1258_v51  ;;  %v5805_v2 = vpack.c.bf16 %v1264_v58, %v1260_v52 }
 0x20c   : > { %v5807_v3 = vpack.c.bf16 %v1263_v62, %v1259_v60  ;;  %v5809_v4 = vpack.c.bf16 %v1265_v63, %v1261_v61  ;;  %2899 = vmatpush1.bf16.msra.mxu1 %v4867_v48  ;;  %v1082_v5 = vpop.f32.mrb[16].mxu1  ;;  %v1195_v6 = vpop.f32.mrb[48].mxu0  ;;  %3125 = vmatpush1.bf16.msra.mxu0 %v4870_v49  ;;  %v4890_v48 = vld [vmem:[#allocation2 + $0x54c] ss:$28 sps:$4 sm:$0xff]   ;;  %v4885_v63 = vld [vmem:[#allocation2 + $0x540] ss:$28 sps:$4 sm:$0xff]  }
 0x20d   : > { %v1083_v9 = vadd.f32 %v1082_v5, %v5722_v26  ;;  %v1196_v10 = vadd.f32 %v1195_v6, %v5726_v27  ;;  %v1084_v24 = vpop.f32.mrb[17].mxu1  ;;  %v1197_v13 = vpop.f32.mrb[49].mxu0  ;;  %2900 = vmatprep.subr.bf16.mxu1 %v4875_v50  ;;  %3126 = vmatprep.subr.bf16.mxu0 %v4878_v59  ;;  %v4888_v5 = vld [vmem:[#allocation2 + $0x548] ss:$28 sps:$4 sm:$0xff]  }
 0x20e   : > { %v1085_v16 = vadd.f32 %v1084_v24, %v5729_v28  ;;  %v1198_v17 = vadd.f32 %v1197_v13, %v5733_v29  ;;  %v1086_v19 = vpop.f32.mrb[18].mxu1  ;;  %v1199_v30 = vpop.f32.mrb[50].mxu0  ;;  %2837 = vmatprep.mubr.bf16.mxu1 %v5807_v3  ;;  %3063 = vmatprep.mubr.bf16.mxu0 %v5807_v3  ;;  %v4896_v24 = vld [vmem:[#allocation2 + $0x584] ss:$28 sps:$4 sm:$0xff]  }
 0x20f   : > { %v1087_v31 = vadd.f32 %v1086_v19, %v5722_v26  ;;  %v1200_v32 = vadd.f32 %v1199_v30, %v5726_v27  ;;  %v1088_v33 = vpop.f32.mrb[19].mxu1  ;;  %v1201_v34 = vpop.f32.mrb[51].mxu0  ;;  %2838 = vmatmul.mubr.bf16.gmra.mrb[44].mxu1 %v5803_v1  ;;  %3064 = vmatmul.mubr.bf16.gmra.mrb[76].mxu0 %v5803_v1  ;;  %v1266_v44 = vmax.f32 %v1083_v9, 0.0  ;;  %v1268_v45 = vmax.f32 %v1196_v10, 0.0  ;;  %v4893_v10 = vld [vmem:[#allocation2 + $0x57c] ss:$28 sps:$4 sm:$0xff]  }
 0x210   : > { %v1089_v39 = vadd.f32 %v1088_v33, %v5729_v28  ;;  %v1202_v40 = vadd.f32 %v1201_v34, %v5733_v29  ;;  %2901 = vmatpush1.bf16.msra.mxu1 %v4873_v7  ;;  %3127 = vmatpush1.bf16.msra.mxu0 %v4876_v8  ;;  %v1267_v49 = vmax.f32 %v1085_v16, 0.0  ;;  %v1269_v50 = vmax.f32 %v1198_v17, 0.0  ;;  %v4891_v34 = vld [vmem:[#allocation2 + $0x578] ss:$28 sps:$4 sm:$0xff]  }
 0x211   : > { %v1270_v46 = vmax.f32 %v1087_v31, 0.0  ;;  %v1272_v47 = vmax.f32 %v1200_v32, 0.0  ;;  %2902 = vmatprep.subr.bf16.mxu1 %v4881_v14  ;;  %3128 = vmatprep.subr.bf16.mxu0 %v4884_v15 }
 0x212   : > { %v1271_v51 = vmax.f32 %v1089_v39, 0.0  ;;  %v1273_v52 = vmax.f32 %v1202_v40, 0.0  ;;  %v4894_v39 = vld [vmem:[#allocation2 + $0x580] ss:$28 sps:$4 sm:$0xff]   ;;  %v4899_v40 = vld [vmem:[#allocation2 + $0x5b4] ss:$28 sps:$4 sm:$0xff]  }
 0x213   : > { %v5823_v53 = vpack.c.bf16 %v1270_v46, %v1266_v44  ;;  %v5825_v58 = vpack.c.bf16 %v1272_v47, %v1268_v45  ;;  %v4902_v45 = vld [vmem:[#allocation2 + $0x5bc] ss:$28 sps:$4 sm:$0xff]  }
 0x214   : > { %v5827_v59 = vpack.c.bf16 %v1271_v51, %v1267_v49  ;;  %v5829_v60 = vpack.c.bf16 %v1273_v52, %v1269_v50  ;;  %2903 = vmatpush1.bf16.msra.mxu1 %v4879_v41  ;;  %v1092_v61 = vpop.f32.mrb[20].mxu1  ;;  %v1205_v62 = vpop.f32.mrb[52].mxu0  ;;  %3129 = vmatpush1.bf16.msra.mxu0 %v4882_v42 }
 0x215   : > { %v1093_v6 = vadd.f32 %v1092_v61, %v5722_v26  ;;  %v1206_v7 = vadd.f32 %v1205_v62, %v5726_v27  ;;  %v1094_v8 = vpop.f32.mrb[21].mxu1  ;;  %v1207_v9 = vpop.f32.mrb[53].mxu0  ;;  %2904 = vmatprep.subr.bf16.mxu1 %v4887_v43  ;;  %3130 = vmatprep.subr.bf16.mxu0 %v4890_v48 }
 0x216   : > { %v1095_v13 = vadd.f32 %v1094_v8, %v5729_v28  ;;  %v1208_v14 = vadd.f32 %v1207_v9, %v5733_v29  ;;  %v1096_v15 = vpop.f32.mrb[22].mxu1  ;;  %v1209_v16 = vpop.f32.mrb[54].mxu0  ;;  %2847 = vmatprep.mubr.bf16.mxu1 %v5827_v59  ;;  %3073 = vmatprep.mubr.bf16.mxu0 %v5827_v59 }
 0x217   : > { %v1097_v17 = vadd.f32 %v1096_v15, %v5722_v26  ;;  %v1210_v19 = vadd.f32 %v1209_v16, %v5726_v27  ;;  %v1098_v30 = vpop.f32.mrb[23].mxu1  ;;  %v1211_v31 = vpop.f32.mrb[55].mxu0  ;;  %2848 = vmatmul.mubr.bf16.gmra.mrb[48].mxu1 %v5823_v53  ;;  %3074 = vmatmul.mubr.bf16.gmra.mrb[80].mxu0 %v5823_v53  ;;  %v1274_v41 = vmax.f32 %v1093_v6, 0.0  ;;  %v1276_v42 = vmax.f32 %v1206_v7, 0.0  ;;  %v4900_v6 = vld [vmem:[#allocation2 + $0x5b8] ss:$28 sps:$4 sm:$0xff]  }
 0x218   : > { %v1099_v32 = vadd.f32 %v1098_v30, %v5729_v28  ;;  %v1212_v33 = vadd.f32 %v1211_v31, %v5733_v29  ;;  %2905 = vmatpush1.bf16.msra.mxu1 %v4885_v63  ;;  %3131 = vmatpush1.bf16.msra.mxu0 %v4888_v5  ;;  %v1275_v46 = vmax.f32 %v1095_v13, 0.0  ;;  %v1277_v47 = vmax.f32 %v1208_v14, 0.0  ;;  %v4897_v5 = vld [vmem:[#allocation2 + $0x5b0] ss:$28 sps:$4 sm:$0xff]  }
 0x219   : > { %v1278_v43 = vmax.f32 %v1097_v17, 0.0  ;;  %v1280_v44 = vmax.f32 %v1210_v19, 0.0  ;;  %2906 = vmatprep.subr.bf16.mxu1 %v4893_v10  ;;  %3132 = vmatprep.subr.bf16.mxu0 %v4896_v24  ;;  %v4905_v24 = vld [vmem:[#allocation2 + $0x5ec] ss:$28 sps:$4 sm:$0xff]   ;;  %v4908_v13 = vld [vmem:[#allocation2 + $0x5f4] ss:$28 sps:$4 sm:$0xff]  }
 0x21a   : > { %v1279_v48 = vmax.f32 %v1099_v32, 0.0  ;;  %v1281_v49 = vmax.f32 %v1212_v33, 0.0 }
 0x21b   : > { %v5843_v50 = vpack.c.bf16 %v1278_v43, %v1274_v41  ;;  %v5845_v51 = vpack.c.bf16 %v1280_v44, %v1276_v42  ;;  %v4911_v41 = vld [vmem:[#allocation2 + $0x624] ss:$28 sps:$4 sm:$0xff]  }
 0x21c   : > { %v5847_v52 = vpack.c.bf16 %v1279_v48, %v1275_v46  ;;  %v5849_v61 = vpack.c.bf16 %v1281_v49, %v1277_v47  ;;  %2907 = vmatpush1.bf16.msra.mxu1 %v4891_v34  ;;  %v1102_v62 = vpop.f32.mrb[24].mxu1  ;;  %v1215_v63 = vpop.f32.mrb[56].mxu0  ;;  %3133 = vmatpush1.bf16.msra.mxu0 %v4894_v39  ;;  %v4903_v39 = vld [vmem:[#allocation2 + $0x5e8] ss:$28 sps:$4 sm:$0xff]  }
 0x21d   : > { %v1103_v7 = vadd.f32 %v1102_v62, %v5722_v26  ;;  %v1216_v8 = vadd.f32 %v1215_v63, %v5726_v27  ;;  %v1104_v9 = vpop.f32.mrb[25].mxu1  ;;  %v1217_v10 = vpop.f32.mrb[57].mxu0  ;;  %2908 = vmatprep.subr.bf16.mxu1 %v4899_v40  ;;  %3134 = vmatprep.subr.bf16.mxu0 %v4902_v45  ;;  %v4906_v40 = vld [vmem:[#allocation2 + $0x5f0] ss:$28 sps:$4 sm:$0xff]  }
 0x21e   : > { %v1105_v14 = vadd.f32 %v1104_v9, %v5729_v28  ;;  %v1218_v15 = vadd.f32 %v1217_v10, %v5733_v29  ;;  %v1106_v16 = vpop.f32.mrb[26].mxu1  ;;  %v1219_v17 = vpop.f32.mrb[58].mxu0  ;;  %2857 = vmatprep.mubr.bf16.mxu1 %v5847_v52  ;;  %3083 = vmatprep.mubr.bf16.mxu0 %v5847_v52  ;;  %v4914_v46 = vld [vmem:[#allocation2 + $0x62c] ss:$28 sps:$4 sm:$0xff]   ;;  %v4909_v10 = vld [vmem:[#allocation2 + $0x620] ss:$28 sps:$4 sm:$0xff]  }
 0x21f   : > { %v1107_v19 = vadd.f32 %v1106_v16, %v5722_v26  ;;  %v1220_v30 = vadd.f32 %v1219_v17, %v5726_v27  ;;  %v1108_v31 = vpop.f32.mrb[27].mxu1  ;;  %v1221_v32 = vpop.f32.mrb[59].mxu0  ;;  %2858 = vmatmul.mubr.bf16.gmra.mrb[52].mxu1 %v5843_v50  ;;  %3084 = vmatmul.mubr.bf16.gmra.mrb[84].mxu0 %v5843_v50  ;;  %v1282_v42 = vmax.f32 %v1103_v7, 0.0  ;;  %v1284_v43 = vmax.f32 %v1216_v8, 0.0  ;;  %v4917_v17 = vld [vmem:[#allocation2 + $0x65c] ss:$28 sps:$4 sm:$0xff]  }
 0x220   : > { %v1109_v33 = vadd.f32 %v1108_v31, %v5729_v28  ;;  %v1222_v34 = vadd.f32 %v1221_v32, %v5733_v29  ;;  %2909 = vmatpush1.bf16.msra.mxu1 %v4897_v5  ;;  %3135 = vmatpush1.bf16.msra.mxu0 %v4900_v6  ;;  %v1283_v47 = vmax.f32 %v1105_v14, 0.0  ;;  %v1285_v48 = vmax.f32 %v1218_v15, 0.0 }
 0x221   : > { %v1286_v44 = vmax.f32 %v1107_v19, 0.0  ;;  %v1288_v45 = vmax.f32 %v1220_v30, 0.0  ;;  %2910 = vmatprep.subr.bf16.mxu1 %v4905_v24  ;;  %3136 = vmatprep.subr.bf16.mxu0 %v4908_v13  ;;  %v4912_v24 = vld [vmem:[#allocation2 + $0x628] ss:$28 sps:$4 sm:$0xff]  }
 0x222   : > { %v1287_v49 = vmax.f32 %v1109_v33, 0.0  ;;  %v1289_v62 = vmax.f32 %v1222_v34, 0.0  ;;  %v4920_v19 = vld [vmem:[#allocation2 + $0x664] ss:$28 sps:$4 sm:$0xff]  }
 0x223   : > { %v5863_v63 = vpack.c.bf16 %v1286_v44, %v1282_v42  ;;  %v5865_v9 = vpack.c.bf16 %v1288_v45, %v1284_v43  ;;  %v4915_v44 = vld [vmem:[#allocation2 + $0x658] ss:$28 sps:$4 sm:$0xff]   ;;  %v4918_v45 = vld [vmem:[#allocation2 + $0x660] ss:$28 sps:$4 sm:$0xff]  }
 0x224   : > { %v5867_v5 = vpack.c.bf16 %v1287_v49, %v1283_v47  ;;  %v5869_v6 = vpack.c.bf16 %v1289_v62, %v1285_v48  ;;  %2911 = vmatpush1.bf16.msra.mxu1 %v4903_v39  ;;  %v1112_v7 = vpop.f32.mrb[28].mxu1  ;;  %v1225_v8 = vpop.f32.mrb[60].mxu0  ;;  %3137 = vmatpush1.bf16.msra.mxu0 %v4906_v40 }
 0x225   : > { %v1113_v13 = vadd.f32 %v1112_v7, %v5722_v26  ;;  %v1226_v14 = vadd.f32 %v1225_v8, %v5726_v27  ;;  %v1114_v15 = vpop.f32.mrb[29].mxu1  ;;  %v1227_v16 = vpop.f32.mrb[61].mxu0  ;;  %2912 = vmatprep.subr.bf16.mxu1 %v4911_v41  ;;  %3138 = vmatprep.subr.bf16.mxu0 %v4914_v46  ;;  %v4923_v46 = vld [vmem:[#allocation2 + $0x694] ss:$28 sps:$4 sm:$0xff]  }
 0x226   : > { %v1115_v30 = vadd.f32 %v1114_v15, %v5729_v28  ;;  %v1228_v31 = vadd.f32 %v1227_v16, %v5733_v29  ;;  %v1116_v32 = vpop.f32.mrb[30].mxu1  ;;  %v1229_v33 = vpop.f32.mrb[62].mxu0  ;;  %2867 = vmatprep.mubr.bf16.mxu1 %v5867_v5  ;;  %3093 = vmatprep.mubr.bf16.mxu0 %v5867_v5 }
 0x227   : > { %v1117_v34 = vadd.f32 %v1116_v32, %v5722_v26  ;;  %v1230_v39 = vadd.f32 %v1229_v33, %v5726_v27  ;;  %v1118_v40 = vpop.f32.mrb[31].mxu1  ;;  %v1231_v42 = vpop.f32.mrb[63].mxu0  ;;  %2868 = vmatmul.mubr.bf16.gmra.mrb[56].mxu1 %v5863_v63  ;;  %3094 = vmatmul.mubr.bf16.gmra.mrb[88].mxu0 %v5863_v63  ;;  %v1290_v47 = vmax.f32 %v1113_v13, 0.0  ;;  %v1292_v48 = vmax.f32 %v1226_v14, 0.0  ;;  %v4926_v27 = vld [vmem:[#allocation2 + $0x69c] ss:$28 sps:$4 sm:$0xff]  }
 0x228   : > { %v1119_v41 = vadd.f32 %v1118_v40, %v5729_v28  ;;  %v1232_v43 = vadd.f32 %v1231_v42, %v5733_v29  ;;  %2913 = vmatpush1.bf16.msra.mxu1 %v4909_v10  ;;  %3139 = vmatpush1.bf16.msra.mxu0 %v4912_v24  ;;  %v1291_v62 = vmax.f32 %v1115_v30, 0.0  ;;  %v1293_v7 = vmax.f32 %v1228_v31, 0.0  ;;  %v4921_v24 = vld [vmem:[#allocation2 + $0x690] ss:$28 sps:$4 sm:$0xff]   ;;  %v4924_v13 = vld [vmem:[#allocation2 + $0x698] ss:$28 sps:$4 sm:$0xff]  }
 0x229   : > { %v1294_v26 = vmax.f32 %v1117_v34, 0.0  ;;  %v1296_v49 = vmax.f32 %v1230_v39, 0.0  ;;  %2914 = vmatprep.subr.bf16.mxu1 %v4917_v17  ;;  %3140 = vmatprep.subr.bf16.mxu0 %v4920_v19  ;;  %v4929_v14 = vld [vmem:[#allocation2 + $0x6cc] ss:$28 sps:$4 sm:$0xff]   ;;  %v4932_v17 = vld [vmem:[#allocation2 + $0x6d4] ss:$28 sps:$4 sm:$0xff]  }
 0x22a   : > { %v1295_v8 = vmax.f32 %v1119_v41, 0.0  ;;  %v1297_v15 = vmax.f32 %v1232_v43, 0.0  ;;  %v4927_v19 = vld [vmem:[#allocation2 + $0x6c8] ss:$28 sps:$4 sm:$0xff]   ;;  %v4930_v30 = vld [vmem:[#allocation2 + $0x6d0] ss:$28 sps:$4 sm:$0xff]  }
 0x22b   : > { %v5883_v16 = vpack.c.bf16 %v1294_v26, %v1290_v47  ;;  %v5885_v28 = vpack.c.bf16 %v1296_v49, %v1292_v48  ;;  %v4935_v31 = vld [vmem:[#allocation2 + $0x14] ss:$28 sps:$4 sm:$0xff]   ;;  %v4938_v34 = vld [vmem:[#allocation2 + $0x4c] ss:$28 sps:$4 sm:$0xff]   ;;  %v4941_v41 = vld [vmem:[#allocation2 + $0x84] ss:$28 sps:$4 sm:$0xff]  }
 0x22c   : > { %v5887_v29 = vpack.c.bf16 %v1295_v8, %v1291_v62  ;;  %v5889_v10 = vpack.c.bf16 %v1297_v15, %v1293_v7  ;;  %2915 = vmatpush1.bf16.msra.mxu1 %v4915_v44  ;;  %3141 = vmatpush1.bf16.msra.mxu0 %v4918_v45  ;;  %v5897_v32 = vld [vmem:[#allocation2 + $0x1d8] ss:$28 sps:$4 sm:$0xff]   ;;  %v4933_v33 = vld [vmem:[#allocation2 + $0x10] ss:$28 sps:$4 sm:$0xff]   ;;  %v4936_v42 = vld [vmem:[#allocation2 + $0x48] ss:$28 sps:$4 sm:$0xff]  }
 0x22d   : > { %2916 = vmatprep.subr.bf16.mxu1 %v4923_v46  ;;  %3142 = vmatprep.subr.bf16.mxu0 %v4926_v27  ;;  %v5900_v39 = vld [vmem:[#allocation2 + $0x18] ss:$28 sps:$4 sm:$0xff]   ;;  %v5903_v40 = vld [vmem:[#allocation2 + $0x210] ss:$28 sps:$4 sm:$0xff]   ;;  %v5912_v44 = vld [vmem:[#allocation2 + $0x248] ss:$28 sps:$4 sm:$0xff]  }
 0x22e   : > { %2877 = vmatprep.mubr.bf16.mxu1 %v5887_v29  ;;  %3103 = vmatprep.mubr.bf16.mxu0 %v5887_v29  ;;  %v5909_v43 = vld [vmem:[#allocation2 + $0x50] ss:$28 sps:$4 sm:$0xff]   ;;  %v4939_v45 = vld [vmem:[#allocation2 + $0x80] ss:$28 sps:$4 sm:$0xff]   ;;  %v5915_v47 = vld [vmem:[#allocation2 + $0x88] ss:$28 sps:$4 sm:$0xff]  }
 0x22f   : > { %2878 = vmatmul.mubr.bf16.gmra.mrb[60].mxu1 %v5883_v16  ;;  %3104 = vmatmul.mubr.bf16.gmra.mrb[92].mxu0 %v5883_v16  ;;  %v4944_v46 = vld [vmem:[#allocation2 + $0xbc] ss:$28 sps:$4 sm:$0xff]   ;;  %v4947_v49 = vld [vmem:[#allocation2 + $0xf4] ss:$28 sps:$4 sm:$0xff]   ;;  %v4952_v8 = vld [vmem:[#allocation2 + $0x12c] ss:$28 sps:$4 sm:$0xff]  }
 0x230   : > { %2917 = vmatpush1.bf16.msra.mxu1 %v4921_v24  ;;  %2920 = vmatprep.mubr.bf16.mxu1 %v5749_v57  ;;  %v5919_v48 = vld [vmem:[#allocation2 + $0x280] ss:$28 sps:$4 sm:$0xff]   ;;  %v4942_v26 = vld [vmem:[#allocation2 + $0xb8] ss:$28 sps:$4 sm:$0xff]   ;;  %v4945_v7 = vld [vmem:[#allocation2 + $0xf0] ss:$28 sps:$4 sm:$0xff]  }
 0x231   : > { %3143 = vmatpush1.bf16.msra.mxu0 %v4924_v13  ;;  %3146 = vmatprep.mubr.bf16.mxu0 %v5749_v57  ;;  %v5925_v27 = vld [vmem:[#allocation2 + $0xc0] ss:$28 sps:$4 sm:$0xff]   ;;  %v5928_v62 = vld [vmem:[#allocation2 + $0x2b8] ss:$28 sps:$4 sm:$0xff]   ;;  %v5935_v24 = vld [vmem:[#allocation2 + $0x2f0] ss:$28 sps:$4 sm:$0xff]  }
 0x232   : > { %2918 = vmatprep.subr.bf16.mxu1 %v4929_v14  ;;  %3144 = vmatprep.subr.bf16.mxu0 %v4932_v17  ;;  %v5931_v15 = vld [vmem:[#allocation2 + $0xf8] ss:$28 sps:$4 sm:$0xff]   ;;  %v4950_v13 = vld [vmem:[#allocation2 + $0x128] ss:$28 sps:$4 sm:$0xff]   ;;  %v5941_v17 = vld [vmem:[#allocation2 + $0x130] ss:$28 sps:$4 sm:$0xff]  }
 0x233   : > { %v4955_v14 = vld [vmem:[#allocation2 + $0x164] ss:$28 sps:$4 sm:$0xff]  }
 0x234   : > { %2919 = vmatpush1.bf16.msra.mxu1 %v4927_v19  ;;  %v5944_v19 = vld [vmem:[#allocation2 + $0x328] ss:$28 sps:$4 sm:$0xff]  }
 0x235   : > { %3145 = vmatpush1.bf16.msra.mxu0 %v4930_v30  ;;  %3227 = vmatprep.subr.bf16.mxu1 %v4935_v31  ;;  %v4953_v30 = vld [vmem:[#allocation2 + $0x160] ss:$28 sps:$4 sm:$0xff]  }
 0x236   : > { %4266 = vmatprep.subr.bf16.mxu0 %v5897_v32  ;;  %v4960_v31 = vld [vmem:[#allocation2 + $0x19c] ss:$28 sps:$4 sm:$0xff]  }
 0x237   : > { %2921 = vmatmul.mubr.bf16.vlgmr.msra.gmra.mrb[32].mxu1 %v5745_v55 }
 0x238   : > { %3147 = vmatmul.mubr.bf16.vlgmr.msra.gmra.mrb[64].mxu0 %v5745_v55  ;;  %3228 = vmatpush1.bf16.msra.mxu1 %v4933_v33  ;;  %v5947_v33 = vld [vmem:[#allocation2 + $0x168] ss:$28 sps:$4 sm:$0xff]  }
 0x239   : > { %2930 = vmatprep.mubr.bf16.mxu1 %v5769_v38  ;;  %3156 = vmatprep.mubr.bf16.mxu0 %v5769_v38 }
 0x23a   : > { %3229 = vmatprep.subr.bf16.mxu1 %v4938_v34  ;;  %4267 = vmatpush3.bf16.msra.mxu0 %v5900_v39  ;;  %v5951_v34 = vld [vmem:[#allocation2 + $0x360] ss:$28 sps:$4 sm:$0xff]  }
 0x23b   : > { %4268 = vmatprep.subr.bf16.mxu0 %v5903_v40 }
 0x23c   : > { %3230 = vmatpush1.bf16.msra.mxu1 %v4936_v42  ;;  %v4958_v42 = vld [vmem:[#allocation2 + $0x198] ss:$28 sps:$4 sm:$0xff]  }
 0x23d   : > { %3231 = vmatprep.subr.bf16.mxu1 %v4941_v41  ;;  %v4963_v41 = vld [vmem:[#allocation2 + $0x1d4] ss:$28 sps:$4 sm:$0xff]  }
 0x23e   : > { %4269 = vmatpush3.bf16.msra.mxu0 %v5909_v43 }
 0x23f   : > { %2931 = vmatmul.mubr.bf16.gmra.mrb[36].mxu1 %v5765_v36  ;;  %4270 = vmatprep.subr.bf16.mxu0 %v5912_v44 }
 0x240   : > { %3157 = vmatmul.mubr.bf16.gmra.mrb[68].mxu0 %v5765_v36  ;;  %3232 = vmatpush1.bf16.msra.mxu1 %v4939_v45  ;;  %v5957_v45 = vld [vmem:[#allocation2 + $0x1a0] ss:$28 sps:$4 sm:$0xff]  }
 0x241   : > { %2940 = vmatprep.mubr.bf16.mxu1 %v5789_v12  ;;  %3166 = vmatprep.mubr.bf16.mxu0 %v5789_v12 }
 0x242   : > { %3233 = vmatprep.subr.bf16.mxu1 %v4944_v46  ;;  %4271 = vmatpush3.bf16.msra.mxu0 %v5915_v47  ;;  %v5012_v46 = vld [vmem:[#allocation2 + $0x558] ss:$28 sps:$4 sm:$0xff]  }
 0x243   : > { %4272 = vmatprep.subr.bf16.mxu0 %v5919_v48 }
 0x244   : > { %3234 = vmatpush1.bf16.msra.mxu1 %v4942_v26  ;;  %v4961_v26 = vld [vmem:[#allocation2 + $0x1d0] ss:$28 sps:$4 sm:$0xff]  }
 0x245   : > { %3235 = vmatprep.subr.bf16.mxu1 %v4947_v49  ;;  %v4968_v49 = vld [vmem:[#allocation2 + $0x20c] ss:$28 sps:$4 sm:$0xff]  }
 0x246   : > { %4273 = vmatpush3.bf16.msra.mxu0 %v5925_v27 }
 0x247   : > { %2941 = vmatmul.mubr.bf16.gmra.mrb[40].mxu1 %v5785_v11  ;;  %4274 = vmatprep.subr.bf16.mxu0 %v5928_v62 }
 0x248   : > { %3167 = vmatmul.mubr.bf16.gmra.mrb[72].mxu0 %v5785_v11  ;;  %3236 = vmatpush1.bf16.msra.mxu1 %v4945_v7  ;;  %v4966_v7 = vld [vmem:[#allocation2 + $0x208] ss:$28 sps:$4 sm:$0xff]  }
 0x249   : > { %2950 = vmatprep.mubr.bf16.mxu1 %v5809_v4  ;;  %3176 = vmatprep.mubr.bf16.mxu0 %v5809_v4 }
 0x24a   : > { %3237 = vmatprep.subr.bf16.mxu1 %v4952_v8  ;;  %4275 = vmatpush3.bf16.msra.mxu0 %v5931_v15  ;;  %v4971_v8 = vld [vmem:[#allocation2 + $0x244] ss:$28 sps:$4 sm:$0xff]  }
 0x24b   : > { %4276 = vmatprep.subr.bf16.mxu0 %v5935_v24 }
 0x24c   : > { %3238 = vmatpush1.bf16.msra.mxu1 %v4950_v13  ;;  %v4969_v13 = vld [vmem:[#allocation2 + $0x240] ss:$28 sps:$4 sm:$0xff]  }
 0x24d   : > { %3239 = vmatprep.subr.bf16.mxu1 %v4955_v14  ;;  %v4976_v14 = vld [vmem:[#allocation2 + $0x27c] ss:$28 sps:$4 sm:$0xff]  }
 0x24e   : > { %4277 = vmatpush3.bf16.msra.mxu0 %v5941_v17 }
 0x24f   : > { %2951 = vmatmul.mubr.bf16.gmra.mrb[44].mxu1 %v5805_v2  ;;  %4278 = vmatprep.subr.bf16.mxu0 %v5944_v19 }
 0x250   : > { %3177 = vmatmul.mubr.bf16.gmra.mrb[76].mxu0 %v5805_v2  ;;  %3240 = vmatpush1.bf16.msra.mxu1 %v4953_v30  ;;  %v4974_v30 = vld [vmem:[#allocation2 + $0x278] ss:$28 sps:$4 sm:$0xff]  }
 0x251   : > { %2960 = vmatprep.mubr.bf16.mxu1 %v5829_v60  ;;  %3186 = vmatprep.mubr.bf16.mxu0 %v5829_v60 }
 0x252   : > { %3241 = vmatprep.subr.bf16.mxu1 %v4960_v31  ;;  %4279 = vmatpush3.bf16.msra.mxu0 %v5947_v33  ;;  %v4979_v31 = vld [vmem:[#allocation2 + $0x2b4] ss:$28 sps:$4 sm:$0xff]  }
 0x253   : > { %4280 = vmatprep.subr.bf16.mxu0 %v5951_v34 }
 0x254   : > { %3242 = vmatpush1.bf16.msra.mxu1 %v4958_v42  ;;  %v4977_v42 = vld [vmem:[#allocation2 + $0x2b0] ss:$28 sps:$4 sm:$0xff]  }
 0x255   : > { %3243 = vmatprep.subr.bf16.mxu1 %v4963_v41  ;;  %v4984_v41 = vld [vmem:[#allocation2 + $0x2ec] ss:$28 sps:$4 sm:$0xff]  }
 0x256   : > { %4281 = vmatpush3.bf16.msra.mxu0 %v5957_v45 }
 0x257   : > { %2961 = vmatmul.mubr.bf16.gmra.mrb[48].mxu1 %v5825_v58  ;;  %4330 = vmatprep.subr.bf16.mxu0 %v5012_v46  ;;  %v4982_v46 = vld [vmem:[#allocation2 + $0x2e8] ss:$28 sps:$4 sm:$0xff]  }
 0x258   : > { %3187 = vmatmul.mubr.bf16.gmra.mrb[80].mxu0 %v5825_v58  ;;  %3244 = vmatpush1.bf16.msra.mxu1 %v4961_v26  ;;  %v4989_v26 = vld [vmem:[#allocation2 + $0x324] ss:$28 sps:$4 sm:$0xff]  }
 0x259   : > { %2970 = vmatprep.mubr.bf16.mxu1 %v5849_v61  ;;  %3196 = vmatprep.mubr.bf16.mxu0 %v5849_v61 }
 0x25a   : > { %3245 = vmatprep.subr.bf16.mxu1 %v4968_v49  ;;  %v4987_v49 = vld [vmem:[#allocation2 + $0x320] ss:$28 sps:$4 sm:$0xff]  }
 0x25c   : > { %3246 = vmatpush1.bf16.msra.mxu1 %v4966_v7  ;;  %v4994_v7 = vld [vmem:[#allocation2 + $0x35c] ss:$28 sps:$4 sm:$0xff]  }
 0x25d   : > { %3247 = vmatprep.subr.bf16.mxu1 %v4971_v8  ;;  %v4992_v8 = vld [vmem:[#allocation2 + $0x358] ss:$28 sps:$4 sm:$0xff]  }
 0x25f   : > { %2971 = vmatmul.mubr.bf16.gmra.mrb[52].mxu1 %v5845_v51 }
 0x260   : > { %3197 = vmatmul.mubr.bf16.gmra.mrb[84].mxu0 %v5845_v51  ;;  %3248 = vmatpush1.bf16.msra.mxu1 %v4969_v13  ;;  %v4999_v13 = vld [vmem:[#allocation2 + $0x394] ss:$28 sps:$4 sm:$0xff]  }
 0x261   : > { %2980 = vmatprep.mubr.bf16.mxu1 %v5869_v6  ;;  %3206 = vmatprep.mubr.bf16.mxu0 %v5869_v6 }
 0x262   : > { %3249 = vmatprep.subr.bf16.mxu1 %v4976_v14  ;;  %v4997_v14 = vld [vmem:[#allocation2 + $0x390] ss:$28 sps:$4 sm:$0xff]  }
 0x264   : > { %3250 = vmatpush1.bf16.msra.mxu1 %v4974_v30  ;;  %v5002_v30 = vld [vmem:[#allocation2 + $0x3cc] ss:$28 sps:$4 sm:$0xff]  }
 0x265   : > { %3251 = vmatprep.subr.bf16.mxu1 %v4979_v31  ;;  %v5013_v31 = vld [vmem:[#allocation2 + $0x398] ss:$28 sps:$4 sm:$0xff]  }
 0x267   : > { %2981 = vmatmul.mubr.bf16.gmra.mrb[56].mxu1 %v5865_v9 }
 0x268   : > { %3207 = vmatmul.mubr.bf16.gmra.mrb[88].mxu0 %v5865_v9  ;;  %3252 = vmatpush1.bf16.msra.mxu1 %v4977_v42  ;;  %v5020_v42 = vld [vmem:[#allocation2 + $0x590] ss:$28 sps:$4 sm:$0xff]  }
 0x269   : > { %2990 = vmatprep.mubr.bf16.mxu1 %v5889_v10  ;;  %3216 = vmatprep.mubr.bf16.mxu0 %v5889_v10 }
 0x26a   : > { %3253 = vmatprep.subr.bf16.mxu1 %v4984_v41  ;;  %v5000_v41 = vld [vmem:[#allocation2 + $0x3c8] ss:$28 sps:$4 sm:$0xff]  }
 0x26c   : > { %3254 = vmatpush1.bf16.msra.mxu1 %v4982_v46  ;;  %v5005_v46 = vld [vmem:[#allocation2 + $0x404] ss:$28 sps:$4 sm:$0xff]  }
 0x26d   : > { %3255 = vmatprep.subr.bf16.mxu1 %v4989_v26  ;;  %v5028_v26 = vld [vmem:[#allocation2 + $0x5c8] ss:$28 sps:$4 sm:$0xff]  }
 0x26f   : > { %2991 = vmatmul.mubr.bf16.gmra.mrb[60].mxu1 %v5885_v28 }
 0x270   : > { %3217 = vmatmul.mubr.bf16.gmra.mrb[92].mxu0 %v5885_v28  ;;  %3256 = vmatpush1.bf16.msra.mxu1 %v4987_v49  ;;  %v5003_v49 = vld [vmem:[#allocation2 + $0x400] ss:$28 sps:$4 sm:$0xff]  }
 0x271   : > { %3259 = vmatprep.mubr.bf16.mxu1 %v5747_v56  ;;  %3485 = vmatprep.mubr.bf16.mxu0 %v5747_v56  ;;  %v5021_v56 = vld [vmem:[#allocation2 + $0x3d0] ss:$28 sps:$4 sm:$0xff]  }
 0x272   : > { %3257 = vmatprep.subr.bf16.mxu1 %v4994_v7  ;;  %v5008_v7 = vld [vmem:[#allocation2 + $0x43c] ss:$28 sps:$4 sm:$0xff]  }
 0x274   : > { %3258 = vmatpush1.bf16.msra.mxu1 %v4992_v8  ;;  %v5029_v8 = vld [vmem:[#allocation2 + $0x408] ss:$28 sps:$4 sm:$0xff]  }
 0x275   : > { %3340 = vmatprep.subr.bf16.mxu1 %v4999_v13  ;;  %v5011_v13 = vld [vmem:[#allocation2 + $0x474] ss:$28 sps:$4 sm:$0xff]  }
 0x277   : > { %3260 = vmatmul.mubr.bf16.vlgmr.msra.gmra.mrb[64].mxu1 %v5743_v54 }
 0x278   : > { %3341 = vmatpush1.bf16.msra.mxu1 %v4997_v14  ;;  %3486 = vmatmul.mubr.bf16.vlgmr.msra.gmra.mrb[96].mxu0 %v5743_v54  ;;  %v5033_v54 = vld [vmem:[#allocation2 + $0x600] ss:$28 sps:$4 sm:$0xff]  }
 0x279   : > { %3269 = vmatprep.mubr.bf16.mxu1 %v5767_v37  ;;  %3493 = vmatprep.mubr.bf16.mxu0 %v5767_v37  ;;  %v5006_v37 = vld [vmem:[#allocation2 + $0x438] ss:$28 sps:$4 sm:$0xff]   ;;  %v5034_v14 = vld [vmem:[#allocation2 + $0x440] ss:$28 sps:$4 sm:$0xff]  }
 0x27a   : > { %3342 = vmatprep.subr.bf16.mxu1 %v5002_v30  ;;  %4331 = vmatpush3.bf16.msra.mxu0 %v5013_v31  ;;  %v5038_v30 = vld [vmem:[#allocation2 + $0x638] ss:$28 sps:$4 sm:$0xff]   ;;  %v5009_v31 = vld [vmem:[#allocation2 + $0x470] ss:$28 sps:$4 sm:$0xff]  }
 0x27b   : > { %4332 = vmatprep.subr.bf16.mxu0 %v5020_v42  ;;  %v5016_v42 = vld [vmem:[#allocation2 + $0x4ac] ss:$28 sps:$4 sm:$0xff]  }
 0x27c   : > { %3343 = vmatpush1.bf16.msra.mxu1 %v5000_v41  ;;  %v5039_v41 = vld [vmem:[#allocation2 + $0x478] ss:$28 sps:$4 sm:$0xff]  }
 0x27d   : > { %3344 = vmatprep.subr.bf16.mxu1 %v5005_v46  ;;  %v5019_v46 = vld [vmem:[#allocation2 + $0x4e4] ss:$28 sps:$4 sm:$0xff]  }
 0x27e   : > { %4333 = vmatpush3.bf16.msra.mxu0 %v5021_v56  ;;  %v5044_v56 = vld [vmem:[#allocation2 + $0x4b0] ss:$28 sps:$4 sm:$0xff]  }
 0x27f   : > { %3270 = vmatmul.mubr.bf16.gmra.mrb[68].mxu1 %v5763_v35  ;;  %4334 = vmatprep.subr.bf16.mxu0 %v5028_v26  ;;  %v5048_v26 = vld [vmem:[#allocation2 + $0x6a8] ss:$28 sps:$4 sm:$0xff]  }
 0x280   : > { %3345 = vmatpush1.bf16.msra.mxu1 %v5003_v49  ;;  %3494 = vmatmul.mubr.bf16.gmra.mrb[100].mxu0 %v5763_v35  ;;  %v5043_v35 = vld [vmem:[#allocation2 + $0x670] ss:$28 sps:$4 sm:$0xff]   ;;  %v5017_v49 = vld [vmem:[#allocation2 + $0x4e0] ss:$28 sps:$4 sm:$0xff]  }
 0x281   : > { %3279 = vmatprep.mubr.bf16.mxu1 %v5787_v0  ;;  %3501 = vmatprep.mubr.bf16.mxu0 %v5787_v0  ;;  %v5014_v0 = vld [vmem:[#allocation2 + $0x4a8] ss:$28 sps:$4 sm:$0xff]  }
 0x282   : > { %3346 = vmatprep.subr.bf16.mxu1 %v5008_v7  ;;  %4335 = vmatpush3.bf16.msra.mxu0 %v5029_v8  ;;  %v5024_v7 = vld [vmem:[#allocation2 + $0x51c] ss:$28 sps:$4 sm:$0xff]   ;;  %v5049_v8 = vld [vmem:[#allocation2 + $0x4e8] ss:$28 sps:$4 sm:$0xff]  }
 0x283   : > { %4336 = vmatprep.subr.bf16.mxu0 %v5033_v54  ;;  %v5027_v54 = vld [vmem:[#allocation2 + $0x554] ss:$28 sps:$4 sm:$0xff]  }
 0x284   : > { %3347 = vmatpush1.bf16.msra.mxu1 %v5006_v37  ;;  %v5054_v37 = vld [vmem:[#allocation2 + $0x520] ss:$28 sps:$4 sm:$0xff]  }
 0x285   : > { %3348 = vmatprep.subr.bf16.mxu1 %v5011_v13  ;;  %v5025_v13 = vld [vmem:[#allocation2 + $0x550] ss:$28 sps:$4 sm:$0xff]  }
 0x286   : > { %4337 = vmatpush3.bf16.msra.mxu0 %v5034_v14  ;;  %v5032_v14 = vld [vmem:[#allocation2 + $0x58c] ss:$28 sps:$4 sm:$0xff]  }
 0x287   : > { %3280 = vmatmul.mubr.bf16.gmra.mrb[72].mxu1 %v5783_v25  ;;  %4338 = vmatprep.subr.bf16.mxu0 %v5038_v30  ;;  %v5035_v30 = vld [vmem:[#allocation2 + $0x5c0] ss:$28 sps:$4 sm:$0xff]  }
 0x288   : > { %3349 = vmatpush1.bf16.msra.mxu1 %v5009_v31  ;;  %3502 = vmatmul.mubr.bf16.gmra.mrb[104].mxu0 %v5783_v25  ;;  %v5053_v25 = vld [vmem:[#allocation2 + $0x6e0] ss:$28 sps:$4 sm:$0xff]  }
 0x289   : > { %3289 = vmatprep.mubr.bf16.mxu1 %v5807_v3  ;;  %3509 = vmatprep.mubr.bf16.mxu0 %v5807_v3  ;;  %v5022_v3 = vld [vmem:[#allocation2 + $0x518] ss:$28 sps:$4 sm:$0xff]  }
 0x28a   : > { %3350 = vmatprep.subr.bf16.mxu1 %v5016_v42  ;;  %4339 = vmatpush3.bf16.msra.mxu0 %v5039_v41  ;;  %v5042_v31 = vld [vmem:[#allocation2 + $0x5fc] ss:$28 sps:$4 sm:$0xff]   ;;  %v5052_v41 = vld [vmem:[#allocation2 + $0x66c] ss:$28 sps:$4 sm:$0xff]  }
 0x28b   : > { %4340 = vmatprep.subr.bf16.mxu0 %v5043_v35  ;;  %v5040_v42 = vld [vmem:[#allocation2 + $0x5f8] ss:$28 sps:$4 sm:$0xff]   ;;  %v5050_v35 = vld [vmem:[#allocation2 + $0x668] ss:$28 sps:$4 sm:$0xff]  }
 0x28c   : > { %3351 = vmatpush1.bf16.msra.mxu1 %v5014_v0  ;;  %v5060_v0 = vld [vmem:[#allocation2 + $0x6dc] ss:$28 sps:$4 sm:$0xff]  }
 0x28d   : > { %3352 = vmatprep.subr.bf16.mxu1 %v5019_v46  ;;  %v5058_v46 = vld [vmem:[#allocation2 + $0x6d8] ss:$28 sps:$4 sm:$0xff]  }
 0x28e   : > { %4341 = vmatpush3.bf16.msra.mxu0 %v5044_v56 }
 0x28f   : > { %3290 = vmatmul.mubr.bf16.gmra.mrb[76].mxu1 %v5803_v1  ;;  %4342 = vmatprep.subr.bf16.mxu0 %v5048_v26 }
 0x290   : > { %3353 = vmatpush1.bf16.msra.mxu1 %v5017_v49  ;;  %3510 = vmatmul.mubr.bf16.gmra.mrb[108].mxu0 %v5803_v1  ;;  %v5030_v1 = vld [vmem:[#allocation2 + $0x588] ss:$28 sps:$4 sm:$0xff]  }
 0x291   : > { %3299 = vmatprep.mubr.bf16.mxu1 %v5827_v59  ;;  %3517 = vmatprep.mubr.bf16.mxu0 %v5827_v59  ;;  %v5037_v59 = vld [vmem:[#allocation2 + $0x5c4] ss:$28 sps:$4 sm:$0xff]  }
 0x292   : > { %3354 = vmatprep.subr.bf16.mxu1 %v5024_v7  ;;  %4343 = vmatpush3.bf16.msra.mxu0 %v5049_v8 }
 0x293   : > { %4344 = vmatprep.subr.bf16.mxu0 %v5053_v25 }
 0x294   : > { %3355 = vmatpush1.bf16.msra.mxu1 %v5022_v3 }
 0x295   : > { %3356 = vmatprep.subr.bf16.mxu1 %v5027_v54 }
 0x296   : > { %4345 = vmatpush3.bf16.msra.mxu0 %v5054_v37 }
 0x297   : > { %3300 = vmatmul.mubr.bf16.gmra.mrb[80].mxu1 %v5823_v53 }
 0x298   : > { %3357 = vmatpush1.bf16.msra.mxu1 %v5025_v13  ;;  %3518 = vmatmul.mubr.bf16.gmra.mrb[112].mxu0 %v5823_v53  ;;  %v5047_v53 = vld [vmem:[#allocation2 + $0x634] ss:$28 sps:$4 sm:$0xff]  }
 0x299   : > { %3309 = vmatprep.mubr.bf16.mxu1 %v5847_v52  ;;  %3525 = vmatprep.mubr.bf16.mxu0 %v5847_v52  ;;  %v5045_v52 = vld [vmem:[#allocation2 + $0x630] ss:$28 sps:$4 sm:$0xff]  }
 0x29a   : > { %3358 = vmatprep.subr.bf16.mxu1 %v5032_v14 }
 0x29c   : > { %3359 = vmatpush1.bf16.msra.mxu1 %v5030_v1 }
 0x29d   : > { %3360 = vmatprep.subr.bf16.mxu1 %v5037_v59 }
 0x29f   : > { %3310 = vmatmul.mubr.bf16.gmra.mrb[84].mxu1 %v5843_v50 }
 0x2a0   : > { %3361 = vmatpush1.bf16.msra.mxu1 %v5035_v30  ;;  %3526 = vmatmul.mubr.bf16.gmra.mrb[116].mxu0 %v5843_v50  ;;  %v5057_v50 = vld [vmem:[#allocation2 + $0x6a4] ss:$28 sps:$4 sm:$0xff]  }
 0x2a1   : > { %3319 = vmatprep.mubr.bf16.mxu1 %v5867_v5  ;;  %3533 = vmatprep.mubr.bf16.mxu0 %v5867_v5  ;;  %v5055_v5 = vld [vmem:[#allocation2 + $0x6a0] ss:$28 sps:$4 sm:$0xff]  }
 0x2a2   : > { %3362 = vmatprep.subr.bf16.mxu1 %v5042_v31 }
 0x2a4   : > { %3363 = vmatpush1.bf16.msra.mxu1 %v5040_v42 }
 0x2a5   : > { %3364 = vmatprep.subr.bf16.mxu1 %v5047_v53 }
 0x2a7   : > { %3320 = vmatmul.mubr.bf16.gmra.mrb[88].mxu1 %v5863_v63 }
 0x2a8   : > { %3365 = vmatpush1.bf16.msra.mxu1 %v5045_v52  ;;  %3534 = vmatmul.mubr.bf16.gmra.mrb[120].mxu0 %v5863_v63 }
 0x2a9   : > { %3329 = vmatprep.mubr.bf16.mxu1 %v5887_v29  ;;  %3582 = vmatprep.mubr.bf16.mxu0 %v5749_v57 }
 0x2aa   : > { %3366 = vmatprep.subr.bf16.mxu1 %v5052_v41 }
 0x2ac   : > { %3367 = vmatpush1.bf16.msra.mxu1 %v5050_v35 }
 0x2ad   : > { %3368 = vmatprep.subr.bf16.mxu1 %v5057_v50 }
 0x2af   : > { %3330 = vmatmul.mubr.bf16.gmra.mrb[92].mxu1 %v5883_v16 }
 0x2b0   : > { %3369 = vmatpush1.bf16.msra.mxu1 %v5055_v5  ;;  %3583 = vmatmul.mubr.bf16.vlgmr.msra.gmra.mrb[124].mxu0 %v5745_v55 }
 0x2b1   : > { %3372 = vmatprep.mubr.bf16.mxu1 %v5749_v57  ;;  %3590 = vmatprep.mubr.bf16.mxu0 %v5769_v38 }
 0x2b2   : > { %3370 = vmatprep.subr.bf16.mxu1 %v5060_v0 }
 0x2b4   : > { %3371 = vmatpush1.bf16.msra.mxu1 %v5058_v46 }
 0x2b5   : > { %4394 = vmatprep.subr.bf16.mxu1 %v5897_v32 }
 0x2b7   : > { %3373 = vmatmul.mubr.bf16.vlgmr.msra.gmra.mrb[64].mxu1 %v5745_v55  ;;  %v6058_v55 = vld [vmem:[%s6365_s6] sm:$0xff] }
 0x2b8   : > { %4402 = vmatpush3.bf16.msra.mxu1 %v5900_v39  ;;  %3591 = vmatmul.mubr.bf16.gmra.mrb[128].mxu0 %v5765_v36  ;;  %v6062_v57 = vrot.slane %v6058_v55, %v5670_v21 }
 0x2b9   : > { %3382 = vmatprep.mubr.bf16.mxu1 %v5769_v38  ;;  %3598 = vmatprep.mubr.bf16.mxu0 %v5789_v12  ;;  %v6071_v38 = vrot.slane %v6058_v55, %v5676_v23 }
 0x2ba   : > { %4395 = vmatprep.subr.bf16.mxu1 %v5903_v40 }
 0x2bc   : > { %4403 = vmatpush3.bf16.msra.mxu1 %v5909_v43 }
 0x2bd   : > { %4396 = vmatprep.subr.bf16.mxu1 %v5912_v44 }
 0x2bf   : > { %3383 = vmatmul.mubr.bf16.gmra.mrb[68].mxu1 %v5765_v36  ;;  %v6067_v36 = vrot.slane %v6058_v55, %v678_v18 }
 0x2c0   : > { %3599 = vmatmul.mubr.bf16.gmra.mrb[132].mxu0 %v5785_v11  ;;  %3392 = vmatprep.mubr.bf16.mxu1 %v5789_v12 }
 0x2c1   : > { %3606 = vmatprep.mubr.bf16.mxu0 %v5809_v4  ;;  %4404 = vmatpush3.bf16.msra.mxu1 %v5915_v47 }
 0x2c2   : > { %4397 = vmatprep.subr.bf16.mxu1 %v5919_v48 }
 0x2c5   : > { %4405 = vmatpush3.bf16.msra.mxu1 %v5925_v27 }
 0x2c6   : > { %4398 = vmatprep.subr.bf16.mxu1 %v5928_v62 }
 0x2c7   : > { %3393 = vmatmul.mubr.bf16.gmra.mrb[72].mxu1 %v5785_v11  ;;  %v6076_v11 = vrot.slane %v6058_v55, %v682_v22 }
 0x2c8   : > { %3607 = vmatmul.mubr.bf16.gmra.mrb[136].mxu0 %v5805_v2  ;;  %3402 = vmatprep.mubr.bf16.mxu1 %v5809_v4 }
 0x2c9   : > { %3614 = vmatprep.mubr.bf16.mxu0 %v5829_v60  ;;  %4406 = vmatpush3.bf16.msra.mxu1 %v5931_v15 }
 0x2ca   : > { %4399 = vmatprep.subr.bf16.mxu1 %v5935_v24 }
 0x2cd   : > { %4407 = vmatpush3.bf16.msra.mxu1 %v5941_v17 }
 0x2ce   : > { %4400 = vmatprep.subr.bf16.mxu1 %v5944_v19 }
 0x2cf   : > { %3403 = vmatmul.mubr.bf16.gmra.mrb[76].mxu1 %v5805_v2 }
 0x2d0   : > { %3615 = vmatmul.mubr.bf16.gmra.mrb[140].mxu0 %v5825_v58  ;;  %3412 = vmatprep.mubr.bf16.mxu1 %v5829_v60 }
 0x2d1   : > { %3622 = vmatprep.mubr.bf16.mxu0 %v5849_v61  ;;  %4408 = vmatpush3.bf16.msra.mxu1 %v5947_v33 }
 0x2d2   : > { %4401 = vmatprep.subr.bf16.mxu1 %v5951_v34 }
 0x2d5   : > { %4409 = vmatpush3.bf16.msra.mxu1 %v5957_v45 }
 0x2d7   : > { %3413 = vmatmul.mubr.bf16.gmra.mrb[80].mxu1 %v5825_v58 }
 0x2d8   : > { %3623 = vmatmul.mubr.bf16.gmra.mrb[144].mxu0 %v5845_v51  ;;  %3422 = vmatprep.mubr.bf16.mxu1 %v5849_v61 }
 0x2d9   : > { %3630 = vmatprep.mubr.bf16.mxu0 %v5869_v6 }
 0x2df   : > { %3423 = vmatmul.mubr.bf16.gmra.mrb[84].mxu1 %v5845_v51 }
 0x2e0   : > { %3631 = vmatmul.mubr.bf16.gmra.mrb[148].mxu0 %v5865_v9  ;;  %3432 = vmatprep.mubr.bf16.mxu1 %v5869_v6 }
 0x2e1   : > { %3638 = vmatprep.mubr.bf16.mxu0 %v5889_v10 }
 0x2e7   : > { %3433 = vmatmul.mubr.bf16.gmra.mrb[88].mxu1 %v5865_v9 }
 0x2e8   : > { %3639 = vmatmul.mubr.bf16.gmra.mrb[152].mxu0 %v5885_v28  ;;  %3442 = vmatprep.mubr.bf16.mxu1 %v5889_v10 }
 0x2ef   : > { %3443 = vmatmul.mubr.bf16.gmra.mrb[92].mxu1 %v5885_v28 }
 0x2f0   : > { %3541 = vmatprep.mubr.bf16.mxu1 %v5887_v29 }
 0x2f7   : > { %3542 = vmatmul.mubr.bf16.vlgmr.msra.gmra.mrb[96].mxu1 %v5883_v16 }
 0x30a   : > { %v2922_v12 = vpop.f32.mrb[32].mxu1 }
 0x30b   : > { %v4410_v2 = vadd.f32 %v2922_v12, %v6062_v57  ;;  %v3148_v4 = vpop.f32.mrb[64].mxu0  ;;  %v2924_v21 = vpop.f32.mrb[33].mxu1 }
 0x30c   : > { %v4442_v58 = vadd.f32 %v3148_v4, %v6067_v36  ;;  %v4411_v18 = vadd.f32 %v2924_v21, %v6071_v38  ;;  %v3150_v60 = vpop.f32.mrb[65].mxu0  ;;  %v2926_v51 = vpop.f32.mrb[34].mxu1 }
 0x30d   : > { %5061 = vtanh.f32 %v4410_v2  ;;  %v4443_v23 = vadd.f32 %v3150_v60, %v6076_v11  ;;  %v4412_v61 = vadd.f32 %v2926_v51, %v6062_v57  ;;  %v3152_v63 = vpop.f32.mrb[66].mxu0  ;;  %v2928_v22 = vpop.f32.mrb[35].mxu1 }
 0x30e   : > { %5063 = vtanh.f32 %v4442_v58  ;;  %v4444_v9 = vadd.f32 %v3152_v63, %v6067_v36  ;;  %v3154_v6 = vpop.f32.mrb[67].mxu0  ;;  %v4413_v16 = vadd.f32 %v2928_v22, %v6071_v38 }
 0x30f   : > { %5065 = vtanh.f32 %v4411_v18  ;;  %v4445_v28 = vadd.f32 %v3154_v6, %v6076_v11 }
 0x310   : > { %5067 = vtanh.f32 %v4443_v23 }
 0x311   : > { %5069 = vtanh.f32 %v4412_v61 }
 0x312   : > { %5071 = vtanh.f32 %v4444_v9  ;;  %v2932_v29 = vpop.f32.mrb[36].mxu1 }
 0x313   : > { %5073 = vtanh.f32 %v4413_v16  ;;  %v4414_v10 = vadd.f32 %v2932_v29, %v6062_v57  ;;  %v3158_v32 = vpop.f32.mrb[68].mxu0  ;;  %v2934_v39 = vpop.f32.mrb[37].mxu1 }
 0x314   : > { %5075 = vtanh.f32 %v4445_v28  ;;  %v4446_v40 = vadd.f32 %v3158_v32, %v6067_v36  ;;  %v4415_v43 = vadd.f32 %v2934_v39, %v6071_v38  ;;  %v3160_v44 = vpop.f32.mrb[69].mxu0  ;;  %v2936_v47 = vpop.f32.mrb[38].mxu1 }
 0x315   : > { %5077 = vtanh.f32 %v4414_v10  ;;  %v4447_v48 = vadd.f32 %v3160_v44, %v6076_v11  ;;  %v4416_v27 = vadd.f32 %v2936_v47, %v6062_v57  ;;  %v3162_v62 = vpop.f32.mrb[70].mxu0  ;;  %v2938_v15 = vpop.f32.mrb[39].mxu1 }
 0x316   : > { %5079 = vtanh.f32 %v4446_v40  ;;  %v4448_v24 = vadd.f32 %v3162_v62, %v6067_v36  ;;  %v3164_v17 = vpop.f32.mrb[71].mxu0  ;;  %v4417_v33 = vadd.f32 %v2938_v15, %v6071_v38 }
 0x317   : > { %v5062_v19 = vpop.eup %5061  ;;  %5081 = vtanh.f32 %v4415_v43  ;;  %v4449_v45 = vadd.f32 %v3164_v17, %v6076_v11 }
 0x318   : > { %v5064_v34 = vpop.eup %5063  ;;  %3759 = vst [vmem:[%s6093_s15] sm:$0xff] %v5062_v19  ;;  %5083 = vtanh.f32 %v4447_v48 }
 0x319   : > { %v5066_v56 = vpop.eup %5065  ;;  %3761 = vst [vmem:[%s6093_s15 + $0x10] sm:$0xff] %v5064_v34  ;;  %5085 = vtanh.f32 %v4416_v27 }
 0x31a   : > { %v5068_v26 = vpop.eup %5067  ;;  %3760 = vst [vmem:[%s6093_s15 + $0x8] sm:$0xff] %v5066_v56  ;;  %5087 = vtanh.f32 %v4448_v24  ;;  %v2942_v49 = vpop.f32.mrb[40].mxu1 }
 0x31b   : > { %v5070_v7 = vpop.eup %5069  ;;  %3762 = vst [vmem:[%s6093_s15 + $0x18] sm:$0xff] %v5068_v26  ;;  %5089 = vtanh.f32 %v4417_v33  ;;  %v4418_v8 = vadd.f32 %v2942_v49, %v6062_v57  ;;  %v3168_v25 = vpop.f32.mrb[72].mxu0 }
 0x31c   : > { %v2944_v3 = vpop.f32.mrb[41].mxu1  ;;  %v5072_v54 = vpop.eup %5071  ;;  %3766 = vst [vmem:[%s6093_s15 + $0x38] sm:$0xff] %v5070_v7  ;;  %5091 = vtanh.f32 %v4449_v45  ;;  %v4450_v37 = vadd.f32 %v3168_v25, %v6067_v36 }
 0x31d   : > { %v4419_v13 = vadd.f32 %v2944_v3, %v6071_v38  ;;  %v3170_v14 = vpop.f32.mrb[73].mxu0  ;;  %v2946_v1 = vpop.f32.mrb[42].mxu1  ;;  %3768 = vst [vmem:[%s6093_s15 + $0x48] sm:$0xff] %v5072_v54  ;;  %5093 = vtanh.f32 %v4418_v8 }
 0x31e   : > { %v5074_v59 = vpop.eup %5073  ;;  %v4451_v30 = vadd.f32 %v3170_v14, %v6076_v11  ;;  %v4420_v31 = vadd.f32 %v2946_v1, %v6062_v57  ;;  %v3172_v42 = vpop.f32.mrb[74].mxu0  ;;  %5095 = vtanh.f32 %v4450_v37 }
 0x31f   : > { %v2948_v53 = vpop.f32.mrb[43].mxu1  ;;  %v5076_v52 = vpop.eup %5075  ;;  %3767 = vst [vmem:[%s6093_s15 + $0x40] sm:$0xff] %v5074_v59  ;;  %v4452_v41 = vadd.f32 %v3172_v42, %v6067_v36  ;;  %5097 = vtanh.f32 %v4419_v13 }
 0x320   : > { %v3174_v35 = vpop.f32.mrb[75].mxu0  ;;  %v5078_v50 = vpop.eup %5077  ;;  %3769 = vst [vmem:[%s6093_s15 + $0x50] sm:$0xff] %v5076_v52  ;;  %v4421_v5 = vadd.f32 %v2948_v53, %v6071_v38  ;;  %5099 = vtanh.f32 %v4451_v30 }
 0x321   : > { %v5080_v0 = vpop.eup %5079  ;;  %3773 = vst [vmem:[%s6093_s15 + $0x70] sm:$0xff] %v5078_v50  ;;  %v4453_v46 = vadd.f32 %v3174_v35, %v6076_v11  ;;  %5101 = vtanh.f32 %v4420_v31 }
 0x322   : > { %v5082_v12 = vpop.eup %5081  ;;  %3775 = vst [vmem:[%s6093_s15 + $0x80] sm:$0xff] %v5080_v0  ;;  %5103 = vtanh.f32 %v4452_v41  ;;  %v2952_v4 = vpop.f32.mrb[44].mxu1 }
 0x323   : > { %v5084_v2 = vpop.eup %5083  ;;  %3774 = vst [vmem:[%s6093_s15 + $0x78] sm:$0xff] %v5082_v12  ;;  %5105 = vtanh.f32 %v4421_v5  ;;  %v4422_v58 = vadd.f32 %v2952_v4, %v6062_v57  ;;  %v3178_v18 = vpop.f32.mrb[76].mxu0 }
 0x324   : > { %v5086_v21 = vpop.eup %5085  ;;  %3776 = vst [vmem:[%s6093_s15 + $0x88] sm:$0xff] %v5084_v2  ;;  %v2954_v60 = vpop.f32.mrb[45].mxu1  ;;  %5107 = vtanh.f32 %v4453_v46  ;;  %v4454_v23 = vadd.f32 %v3178_v18, %v6067_v36 }
 0x325   : > { %v5088_v51 = vpop.eup %5087  ;;  %3780 = vst [vmem:[%s6093_s15 + $0xa8] sm:$0xff] %v5086_v21  ;;  %v4423_v61 = vadd.f32 %v2954_v60, %v6071_v38  ;;  %v3180_v63 = vpop.f32.mrb[77].mxu0  ;;  %5109 = vtanh.f32 %v4422_v58 }
 0x326   : > { %v2956_v22 = vpop.f32.mrb[46].mxu1  ;;  %v5090_v9 = vpop.eup %5089  ;;  %3782 = vst [vmem:[%s6093_s15 + $0xb8] sm:$0xff] %v5088_v51  ;;  %v4455_v6 = vadd.f32 %v3180_v63, %v6076_v11  ;;  %5111 = vtanh.f32 %v4454_v23 }
 0x327   : > { %v4424_v16 = vadd.f32 %v2956_v22, %v6062_v57  ;;  %v3182_v28 = vpop.f32.mrb[78].mxu0  ;;  %v2958_v29 = vpop.f32.mrb[47].mxu1  ;;  %3781 = vst [vmem:[%s6093_s15 + $0xb0] sm:$0xff] %v5090_v9  ;;  %5113 = vtanh.f32 %v4423_v61 }
 0x328   : > { %v5092_v10 = vpop.eup %5091  ;;  %v4456_v32 = vadd.f32 %v3182_v28, %v6067_v36  ;;  %v3184_v39 = vpop.f32.mrb[79].mxu0  ;;  %v4425_v43 = vadd.f32 %v2958_v29, %v6071_v38  ;;  %5115 = vtanh.f32 %v4455_v6 }
 0x329   : > { %v5094_v40 = vpop.eup %5093  ;;  %3783 = vst [vmem:[%s6093_s15 + $0xc0] sm:$0xff] %v5092_v10  ;;  %v4457_v47 = vadd.f32 %v3184_v39, %v6076_v11  ;;  %5117 = vtanh.f32 %v4424_v16 }
 0x32a   : > { %v5096_v44 = vpop.eup %5095  ;;  %3787 = vst [vmem:[%s6093_s15 + $0xe0] sm:$0xff] %v5094_v40  ;;  %5119 = vtanh.f32 %v4456_v32  ;;  %v2962_v62 = vpop.f32.mrb[48].mxu1 }
 0x32b   : > { %v5098_v48 = vpop.eup %5097  ;;  %3789 = vst [vmem:[%s6093_s15 + $0xf0] sm:$0xff] %v5096_v44  ;;  %5121 = vtanh.f32 %v4425_v43  ;;  %v4426_v24 = vadd.f32 %v2962_v62, %v6062_v57  ;;  %v3188_v17 = vpop.f32.mrb[80].mxu0 }
 0x32c   : > { %v5100_v27 = vpop.eup %5099  ;;  %3788 = vst [vmem:[%s6093_s15 + $0xe8] sm:$0xff] %v5098_v48  ;;  %v2964_v19 = vpop.f32.mrb[49].mxu1  ;;  %5123 = vtanh.f32 %v4457_v47  ;;  %v4458_v34 = vadd.f32 %v3188_v17, %v6067_v36 }
 0x32d   : > { %v5102_v15 = vpop.eup %5101  ;;  %3790 = vst [vmem:[%s6093_s15 + $0xf8] sm:$0xff] %v5100_v27  ;;  %v4427_v45 = vadd.f32 %v2964_v19, %v6071_v38  ;;  %v3190_v56 = vpop.f32.mrb[81].mxu0  ;;  %5125 = vtanh.f32 %v4426_v24 }
 0x32e   : > { %v5104_v33 = vpop.eup %5103  ;;  %3794 = vst [vmem:[%s6093_s15 + $0x118] sm:$0xff] %v5102_v15  ;;  %v2966_v26 = vpop.f32.mrb[50].mxu1  ;;  %v4459_v7 = vadd.f32 %v3190_v56, %v6076_v11  ;;  %5127 = vtanh.f32 %v4458_v34 }
 0x32f   : > { %v5106_v49 = vpop.eup %5105  ;;  %3796 = vst [vmem:[%s6093_s15 + $0x128] sm:$0xff] %v5104_v33  ;;  %v4428_v8 = vadd.f32 %v2966_v26, %v6062_v57  ;;  %v3192_v25 = vpop.f32.mrb[82].mxu0  ;;  %5129 = vtanh.f32 %v4427_v45 }
 0x330   : > { %v2968_v3 = vpop.f32.mrb[51].mxu1  ;;  %v5108_v54 = vpop.eup %5107  ;;  %3795 = vst [vmem:[%s6093_s15 + $0x120] sm:$0xff] %v5106_v49  ;;  %v4460_v37 = vadd.f32 %v3192_v25, %v6067_v36  ;;  %5131 = vtanh.f32 %v4459_v7 }
 0x331   : > { %v3194_v13 = vpop.f32.mrb[83].mxu0  ;;  %v5110_v14 = vpop.eup %5109  ;;  %3797 = vst [vmem:[%s6093_s15 + $0x130] sm:$0xff] %v5108_v54  ;;  %v4429_v1 = vadd.f32 %v2968_v3, %v6071_v38  ;;  %5133 = vtanh.f32 %v4428_v8 }
 0x332   : > { %v5112_v59 = vpop.eup %5111  ;;  %3801 = vst [vmem:[%s6093_s15 + $0x150] sm:$0xff] %v5110_v14  ;;  %v4461_v30 = vadd.f32 %v3194_v13, %v6076_v11  ;;  %5135 = vtanh.f32 %v4460_v37  ;;  %v2972_v53 = vpop.f32.mrb[52].mxu1 }
 0x333   : > { %v5114_v31 = vpop.eup %5113  ;;  %3803 = vst [vmem:[%s6093_s15 + $0x160] sm:$0xff] %v5112_v59  ;;  %5137 = vtanh.f32 %v4429_v1  ;;  %v4430_v41 = vadd.f32 %v2972_v53, %v6062_v57  ;;  %v3198_v35 = vpop.f32.mrb[84].mxu0 }
 0x334   : > { %v5116_v42 = vpop.eup %5115  ;;  %3802 = vst [vmem:[%s6093_s15 + $0x158] sm:$0xff] %v5114_v31  ;;  %v2974_v50 = vpop.f32.mrb[53].mxu1  ;;  %5139 = vtanh.f32 %v4461_v30  ;;  %v4462_v0 = vadd.f32 %v3198_v35, %v6067_v36 }
 0x335   : > { %v5118_v52 = vpop.eup %5117  ;;  %3804 = vst [vmem:[%s6093_s15 + $0x168] sm:$0xff] %v5116_v42  ;;  %v4431_v46 = vadd.f32 %v2974_v50, %v6071_v38  ;;  %v3200_v12 = vpop.f32.mrb[85].mxu0  ;;  %5141 = vtanh.f32 %v4430_v41 }
 0x336   : > { %v5120_v5 = vpop.eup %5119  ;;  %3808 = vst [vmem:[%s6093_s15 + $0x188] sm:$0xff] %v5118_v52  ;;  %v2976_v2 = vpop.f32.mrb[54].mxu1  ;;  %v4463_v21 = vadd.f32 %v3200_v12, %v6076_v11  ;;  %5143 = vtanh.f32 %v4462_v0 }
 0x337   : > { %v5122_v4 = vpop.eup %5121  ;;  %3810 = vst [vmem:[%s6093_s15 + $0x198] sm:$0xff] %v5120_v5  ;;  %v4432_v58 = vadd.f32 %v2976_v2, %v6062_v57  ;;  %v3202_v18 = vpop.f32.mrb[86].mxu0  ;;  %5145 = vtanh.f32 %v4431_v46 }
 0x338   : > { %v2978_v60 = vpop.f32.mrb[55].mxu1  ;;  %v5124_v51 = vpop.eup %5123  ;;  %3809 = vst [vmem:[%s6093_s15 + $0x190] sm:$0xff] %v5122_v4  ;;  %v4464_v23 = vadd.f32 %v3202_v18, %v6067_v36  ;;  %5147 = vtanh.f32 %v4463_v21 }
 0x339   : > { %v3204_v61 = vpop.f32.mrb[87].mxu0  ;;  %v5126_v63 = vpop.eup %5125  ;;  %3811 = vst [vmem:[%s6093_s15 + $0x1a0] sm:$0xff] %v5124_v51  ;;  %v4433_v22 = vadd.f32 %v2978_v60, %v6071_v38  ;;  %5149 = vtanh.f32 %v4432_v58 }
 0x33a   : > { %v5128_v9 = vpop.eup %5127  ;;  %3815 = vst [vmem:[%s6093_s15 + $0x1c0] sm:$0xff] %v5126_v63  ;;  %v4465_v6 = vadd.f32 %v3204_v61, %v6076_v11  ;;  %5151 = vtanh.f32 %v4464_v23  ;;  %v2982_v29 = vpop.f32.mrb[56].mxu1 }
 0x33b   : > { %v5130_v16 = vpop.eup %5129  ;;  %3817 = vst [vmem:[%s6093_s15 + $0x1d0] sm:$0xff] %v5128_v9  ;;  %5153 = vtanh.f32 %v4433_v22  ;;  %v4434_v32 = vadd.f32 %v2982_v29, %v6062_v57  ;;  %v3208_v39 = vpop.f32.mrb[88].mxu0 }
 0x33c   : > { %v5132_v28 = vpop.eup %5131  ;;  %3816 = vst [vmem:[%s6093_s15 + $0x1c8] sm:$0xff] %v5130_v16  ;;  %v2984_v40 = vpop.f32.mrb[57].mxu1  ;;  %5155 = vtanh.f32 %v4465_v6  ;;  %v4466_v44 = vadd.f32 %v3208_v39, %v6067_v36 }
 0x33d   : > { %v5134_v10 = vpop.eup %5133  ;;  %3818 = vst [vmem:[%s6093_s15 + $0x1d8] sm:$0xff] %v5132_v28  ;;  %v4435_v47 = vadd.f32 %v2984_v40, %v6071_v38  ;;  %v3210_v48 = vpop.f32.mrb[89].mxu0  ;;  %5157 = vtanh.f32 %v4434_v32 }
 0x33e   : > { %v5136_v43 = vpop.eup %5135  ;;  %3822 = vst [vmem:[%s6093_s15 + $0x1f8] sm:$0xff] %v5134_v10  ;;  %v2986_v27 = vpop.f32.mrb[58].mxu1  ;;  %v4467_v15 = vadd.f32 %v3210_v48, %v6076_v11  ;;  %5159 = vtanh.f32 %v4466_v44 }
 0x33f   : > { %v5138_v62 = vpop.eup %5137  ;;  %3824 = vst [vmem:[%s6093_s15 + $0x208] sm:$0xff] %v5136_v43  ;;  %v4436_v24 = vadd.f32 %v2986_v27, %v6062_v57  ;;  %v3212_v17 = vpop.f32.mrb[90].mxu0  ;;  %5161 = vtanh.f32 %v4435_v47 }
 0x340   : > { %v2988_v19 = vpop.f32.mrb[59].mxu1  ;;  %v5140_v33 = vpop.eup %5139  ;;  %3823 = vst [vmem:[%s6093_s15 + $0x200] sm:$0xff] %v5138_v62  ;;  %v4468_v34 = vadd.f32 %v3212_v17, %v6067_v36  ;;  %5163 = vtanh.f32 %v4467_v15 }
 0x341   : > { %v3214_v45 = vpop.f32.mrb[91].mxu0  ;;  %v5142_v56 = vpop.eup %5141  ;;  %3825 = vst [vmem:[%s6093_s15 + $0x210] sm:$0xff] %v5140_v33  ;;  %v4437_v26 = vadd.f32 %v2988_v19, %v6071_v38  ;;  %5165 = vtanh.f32 %v4436_v24 }
 0x342   : > { %v5144_v49 = vpop.eup %5143  ;;  %3829 = vst [vmem:[%s6093_s15 + $0x230] sm:$0xff] %v5142_v56  ;;  %v4469_v7 = vadd.f32 %v3214_v45, %v6076_v11  ;;  %5167 = vtanh.f32 %v4468_v34  ;;  %v2992_v3 = vpop.f32.mrb[60].mxu1 }
 0x343   : > { %v5146_v8 = vpop.eup %5145  ;;  %3831 = vst [vmem:[%s6093_s15 + $0x240] sm:$0xff] %v5144_v49  ;;  %5169 = vtanh.f32 %v4437_v26  ;;  %v4438_v37 = vadd.f32 %v2992_v3, %v6062_v57  ;;  %v3218_v13 = vpop.f32.mrb[92].mxu0 }
 0x344   : > { %v5148_v25 = vpop.eup %5147  ;;  %3830 = vst [vmem:[%s6093_s15 + $0x238] sm:$0xff] %v5146_v8  ;;  %v2994_v14 = vpop.f32.mrb[61].mxu1  ;;  %5171 = vtanh.f32 %v4469_v7  ;;  %v4470_v59 = vadd.f32 %v3218_v13, %v6067_v36 }
 0x345   : > { %v5150_v54 = vpop.eup %5149  ;;  %3832 = vst [vmem:[%s6093_s15 + $0x248] sm:$0xff] %v5148_v25  ;;  %v4439_v30 = vadd.f32 %v2994_v14, %v6071_v38  ;;  %v3220_v31 = vpop.f32.mrb[93].mxu0  ;;  %5173 = vtanh.f32 %v4438_v37 }
 0x346   : > { %v5152_v1 = vpop.eup %5151  ;;  %3836 = vst [vmem:[%s6093_s15 + $0x268] sm:$0xff] %v5150_v54  ;;  %v2996_v42 = vpop.f32.mrb[62].mxu1  ;;  %v4471_v52 = vadd.f32 %v3220_v31, %v6076_v11  ;;  %5175 = vtanh.f32 %v4470_v59 }
 0x347   : > { %v5154_v53 = vpop.eup %5153  ;;  %3838 = vst [vmem:[%s6093_s15 + $0x278] sm:$0xff] %v5152_v1  ;;  %v4440_v41 = vadd.f32 %v2996_v42, %v6062_v57  ;;  %v3222_v35 = vpop.f32.mrb[94].mxu0  ;;  %5177 = vtanh.f32 %v4439_v30 }
 0x348   : > { %v2998_v50 = vpop.f32.mrb[63].mxu1  ;;  %v5156_v5 = vpop.eup %5155  ;;  %3837 = vst [vmem:[%s6093_s15 + $0x270] sm:$0xff] %v5154_v53  ;;  %v4472_v0 = vadd.f32 %v3222_v35, %v6067_v36  ;;  %5179 = vtanh.f32 %v4471_v52 }
 0x349   : > { %v3224_v46 = vpop.f32.mrb[95].mxu0  ;;  %v5158_v12 = vpop.eup %5157  ;;  %3839 = vst [vmem:[%s6093_s15 + $0x280] sm:$0xff] %v5156_v5  ;;  %v4441_v2 = vadd.f32 %v2998_v50, %v6071_v38  ;;  %5181 = vtanh.f32 %v4440_v41  ;;  %v1614_v41 = vsub.s32 6, %v5667_v20 }
 0x34a   : > { %v5160_v4 = vpop.eup %5159  ;;  %3843 = vst [vmem:[%s6093_s15 + $0x2a0] sm:$0xff] %v5158_v12  ;;  %v4473_v57 = vadd.f32 %v3224_v46, %v6076_v11  ;;  %5183 = vtanh.f32 %v4472_v0 }
 0x34b   : > { %v5162_v21 = vpop.eup %5161  ;;  %3845 = vst [vmem:[%s6093_s15 + $0x2b0] sm:$0xff] %v5160_v4  ;;  %5185 = vtanh.f32 %v4441_v2  ;;  %v4282_v18 = vpop.f32.mrb[96].mxu0  ;;  %v6238_v46 = vrot.slane %v6058_v55, %v1614_v41  ;;  %v1606_v2 = vsub.s32 4, %v5667_v20 }
 0x34c   : > { %v5164_v58 = vpop.eup %5163  ;;  %3844 = vst [vmem:[%s6093_s15 + $0x2a8] sm:$0xff] %v5162_v21  ;;  %5187 = vtanh.f32 %v4473_v57  ;;  %v4283_v60 = vpop.f32.mrb[97].mxu0  ;;  %v1610_v57 = vsub.s32 5, %v5667_v20 }
 0x34d   : > { %v5166_v36 = vpop.eup %5165  ;;  %3846 = vst [vmem:[%s6093_s15 + $0x2b8] sm:$0xff] %v5164_v58  ;;  %v6202_v51 = vadd.f32 %v4283_v60, %v4282_v18  ;;  %v4285_v23 = vpop.f32.mrb[98].mxu0 }
 0x34e   : > { %v5168_v38 = vpop.eup %5167  ;;  %3850 = vst [vmem:[%s6093_s15 + $0x2d8] sm:$0xff] %v5166_v36  ;;  %v4286_v63 = vpop.f32.mrb[99].mxu0 }
 0x34f   : > { %v5170_v11 = vpop.eup %5169  ;;  %3852 = vst [vmem:[%s6093_s15 + $0x2e8] sm:$0xff] %v5168_v38  ;;  %v4287_v9 = vadd.f32 %v4286_v63, %v4285_v23  ;;  %v3488_v21 = vadd.f32 %v6202_v51, %v6238_v46  ;;  %v6246_v23 = vrot.slane %v6058_v55, %v1606_v2 }
 0x350   : > { %v5172_v61 = vpop.eup %5171  ;;  %3851 = vst [vmem:[%s6093_s15 + $0x2e0] sm:$0xff] %v5170_v11 }
 0x351   : > { %v5174_v22 = vpop.eup %5173  ;;  %3853 = vst [vmem:[%s6093_s15 + $0x2f0] sm:$0xff] %v5172_v61  ;;  %v3491_v38 = vadd.f32 %v4287_v9, %v6238_v46  ;;  %v6249_v61 = vrot.slane %v6058_v55, %v1610_v57 }
 0x352   : > { %v5176_v6 = vpop.eup %5175  ;;  %3857 = vst [vmem:[%s6093_s15 + $0x310] sm:$0xff] %v5174_v22 }
 0x353   : > { %v5178_v16 = vpop.eup %5177  ;;  %3859 = vst [vmem:[%s6093_s15 + $0x320] sm:$0xff] %v5176_v6  ;;  %v4288_v10 = vpop.f32.mrb[100].mxu0 }
 0x354   : > { %v5180_v28 = vpop.eup %5179  ;;  %3858 = vst [vmem:[%s6093_s15 + $0x318] sm:$0xff] %v5178_v16  ;;  %v4289_v39 = vpop.f32.mrb[101].mxu0 }
 0x355   : > { %v5182_v29 = vpop.eup %5181  ;;  %3860 = vst [vmem:[%s6093_s15 + $0x328] sm:$0xff] %v5180_v28  ;;  %v4290_v43 = vadd.f32 %v4289_v39, %v4288_v10  ;;  %v4291_v44 = vpop.f32.mrb[102].mxu0 }
 0x356   : > { %v5184_v32 = vpop.eup %5183  ;;  %3864 = vst [vmem:[%s6093_s15 + $0x348] sm:$0xff] %v5182_v29  ;;  %v4292_v48 = vpop.f32.mrb[103].mxu0 }
 0x357   : > { %v5186_v40 = vpop.eup %5185  ;;  %3866 = vst [vmem:[%s6093_s15 + $0x358] sm:$0xff] %v5184_v32  ;;  %v6214_v27 = vadd.f32 %v4292_v48, %v4291_v44  ;;  %v3496_v29 = vadd.f32 %v4290_v43, %v6238_v46 }
 0x358   : > { %v5188_v47 = vpop.eup %5187  ;;  %3865 = vst [vmem:[%s6093_s15 + $0x350] sm:$0xff] %v5186_v40 }
 0x359   : > { %3867 = vst [vmem:[%s6093_s15 + $0x360] sm:$0xff] %v5188_v47  ;;  %v3499_v47 = vadd.f32 %v6214_v27, %v6238_v46 }
 0x35b   : > { %v4294_v62 = vpop.f32.mrb[104].mxu0 }
 0x35c   : > { %v4295_v15 = vpop.f32.mrb[105].mxu0 }
 0x35d   : > { %v6216_v24 = vadd.f32 %v4295_v15, %v4294_v62  ;;  %v4297_v17 = vpop.f32.mrb[106].mxu0 }
 0x35e   : > { %v4298_v19 = vpop.f32.mrb[107].mxu0 }
 0x35f   : > { %v6218_v33 = vadd.f32 %v4298_v19, %v4297_v17 }
 0x363   : > { %v4300_v34 = vpop.f32.mrb[108].mxu0 }
 0x364   : > { %v4301_v45 = vpop.f32.mrb[109].mxu0 }
 0x365   : > { %v6220_v56 = vadd.f32 %v4301_v45, %v4300_v34  ;;  %v4303_v26 = vpop.f32.mrb[110].mxu0 }
 0x366   : > { %v4304_v49 = vpop.f32.mrb[111].mxu0 }
 0x367   : > { %v6222_v7 = vadd.f32 %v4304_v49, %v4303_v26 }
 0x36b   : > { %v4306_v8 = vpop.f32.mrb[112].mxu0 }
 0x36c   : > { %v4307_v25 = vpop.f32.mrb[113].mxu0 }
 0x36d   : > { %v6224_v3 = vadd.f32 %v4307_v25, %v4306_v8  ;;  %v4309_v54 = vpop.f32.mrb[114].mxu0  ;;  %v3504_v25 = vadd.f32 %v6216_v24, %v6238_v46 }
 0x36e   : > { %v4310_v37 = vpop.f32.mrb[115].mxu0 }
 0x36f   : > { %v6226_v13 = vadd.f32 %v4310_v37, %v4309_v54 }
 0x373   : > { %v4312_v14 = vpop.f32.mrb[116].mxu0 }
 0x374   : > { %v4313_v1 = vpop.f32.mrb[117].mxu0 }
 0x375   : > { %v6228_v59 = vadd.f32 %v4313_v1, %v4312_v14  ;;  %v4315_v30 = vpop.f32.mrb[118].mxu0 }
 0x376   : > { %v4316_v31 = vpop.f32.mrb[119].mxu0 }
 0x377   : > { %v6230_v42 = vadd.f32 %v4316_v31, %v4315_v30 }
 0x37b   : > { %v4318_v53 = vpop.f32.mrb[120].mxu0 }
 0x37c   : > { %v4319_v52 = vpop.f32.mrb[121].mxu0 }
 0x37d   : > { %v6233_v35 = vadd.f32 %v4319_v52, %v4318_v53  ;;  %v4321_v50 = vpop.f32.mrb[122].mxu0  ;;  %v3507_v52 = vadd.f32 %v6218_v33, %v6238_v46 }
 0x37e   : > { %v4322_v5 = vpop.f32.mrb[123].mxu0 }
 0x37f   : > { %v6235_v0 = vadd.f32 %v4322_v5, %v4321_v50 }
 0x383   : > { %v4346_v12 = vpop.f32.mrb[124].mxu0 }
 0x384   : > { %v4347_v4 = vpop.f32.mrb[125].mxu0 }
 0x385   : > { %v4348_v58 = vadd.f32 %v4347_v4, %v4346_v12  ;;  %v4349_v36 = vpop.f32.mrb[126].mxu0 }
 0x386   : > { %v4350_v18 = vpop.f32.mrb[127].mxu0 }
 0x387   : > { %v3585_v60 = vadd.f32 %v4348_v58, %v3488_v21  ;;  %v4351_v11 = vadd.f32 %v4350_v18, %v4349_v36 }
 0x389   : > { %5189 = vtanh.f32 %v3585_v60  ;;  %v3588_v63 = vadd.f32 %v4351_v11, %v3491_v38  ;;  %v3512_v11 = vadd.f32 %v6220_v56, %v6238_v46 }
 0x38a   : > { %v3374_v22 = vpop.f32.mrb[64].mxu1 }
 0x38b   : > { %5191 = vtanh.f32 %v3588_v63  ;;  %v4474_v20 = vadd.f32 %v3374_v22, %v6246_v23  ;;  %v4352_v51 = vpop.f32.mrb[128].mxu0  ;;  %v3376_v6 = vpop.f32.mrb[65].mxu1 }
 0x38c   : > { %v4475_v16 = vadd.f32 %v3376_v6, %v6249_v61  ;;  %v4353_v28 = vpop.f32.mrb[129].mxu0  ;;  %v3378_v9 = vpop.f32.mrb[66].mxu1 }
 0x38d   : > { %5193 = vtanh.f32 %v4474_v20  ;;  %v4354_v10 = vadd.f32 %v4353_v28, %v4352_v51  ;;  %v4476_v32 = vadd.f32 %v3378_v9, %v6246_v23  ;;  %v4355_v55 = vpop.f32.mrb[130].mxu0  ;;  %v3380_v39 = vpop.f32.mrb[67].mxu1  ;;  %v3515_v9 = vadd.f32 %v6222_v7, %v6238_v46 }
 0x38e   : > { %5195 = vtanh.f32 %v4475_v16  ;;  %v4477_v40 = vadd.f32 %v3380_v39, %v6249_v61  ;;  %v4356_v44 = vpop.f32.mrb[131].mxu0 }
 0x38f   : > { %v3593_v48 = vadd.f32 %v4354_v10, %v3496_v29  ;;  %5197 = vtanh.f32 %v4476_v32  ;;  %v4357_v62 = vadd.f32 %v4356_v44, %v4355_v55 }
 0x390   : > { %5199 = vtanh.f32 %v4477_v40 }
 0x391   : > { %5201 = vtanh.f32 %v3593_v48  ;;  %v3596_v43 = vadd.f32 %v4357_v62, %v3499_v47 }
 0x392   : > { %v3384_v15 = vpop.f32.mrb[68].mxu1 }
 0x393   : > { %v5190_v17 = vpop.eup %5189  ;;  %5203 = vtanh.f32 %v3596_v43  ;;  %v4478_v19 = vadd.f32 %v3384_v15, %v6246_v23  ;;  %v4358_v34 = vpop.f32.mrb[132].mxu0 }
 0x394   : > { %v3386_v45 = vpop.f32.mrb[69].mxu1  ;;  %3765 = vst [vmem:[%s6093_s15 + $0x30] sm:$0xff] %v5190_v17  ;;  %v4359_v49 = vpop.f32.mrb[133].mxu0 }
 0x395   : > { %v4479_v26 = vadd.f32 %v3386_v45, %v6249_v61  ;;  %v3388_v8 = vpop.f32.mrb[70].mxu1  ;;  %v5192_v27 = vpop.eup %5191  ;;  %5205 = vtanh.f32 %v4478_v19  ;;  %v4360_v54 = vadd.f32 %v4359_v49, %v4358_v34  ;;  %v3520_v19 = vadd.f32 %v6224_v3, %v6238_v46 }
 0x396   : > { %v4480_v37 = vadd.f32 %v3388_v8, %v6246_v23  ;;  %v4361_v14 = vpop.f32.mrb[134].mxu0  ;;  %v3390_v1 = vpop.f32.mrb[71].mxu1  ;;  %3772 = vst [vmem:[%s6093_s15 + $0x68] sm:$0xff] %v5192_v27 }
 0x397   : > { %5207 = vtanh.f32 %v4479_v26  ;;  %v4481_v30 = vadd.f32 %v3390_v1, %v6249_v61  ;;  %v4362_v31 = vpop.f32.mrb[135].mxu0  ;;  %v5194_v53 = vpop.eup %5193  ;;  %v3601_v24 = vadd.f32 %v4360_v54, %v3504_v25  ;;  %v3523_v54 = vadd.f32 %v6226_v13, %v6238_v46 }
 0x398   : > { %5209 = vtanh.f32 %v4480_v37  ;;  %v4363_v41 = vadd.f32 %v4362_v31, %v4361_v14  ;;  %v5196_v50 = vpop.eup %5195  ;;  %3763 = vst [vmem:[%s6093_s15 + $0x20] sm:$0xff] %v5194_v53 }
 0x399   : > { %5211 = vtanh.f32 %v4481_v30  ;;  %v5198_v5 = vpop.eup %5197  ;;  %3764 = vst [vmem:[%s6093_s15 + $0x28] sm:$0xff] %v5196_v50 }
 0x39a   : > { %5213 = vtanh.f32 %v3601_v24  ;;  %v3604_v12 = vadd.f32 %v4363_v41, %v3507_v52  ;;  %v5200_v2 = vpop.eup %5199  ;;  %3770 = vst [vmem:[%s6093_s15 + $0x58] sm:$0xff] %v5198_v5  ;;  %v3394_v4 = vpop.f32.mrb[72].mxu1 }
 0x39b   : > { %v5202_v57 = vpop.eup %5201  ;;  %3771 = vst [vmem:[%s6093_s15 + $0x60] sm:$0xff] %v5200_v2  ;;  %v4482_v33 = vadd.f32 %v3394_v4, %v6246_v23  ;;  %v4364_v21 = vpop.f32.mrb[136].mxu0  ;;  %v3528_v4 = vadd.f32 %v6228_v59, %v6238_v46 }
 0x39c   : > { %5215 = vtanh.f32 %v3604_v12  ;;  %v3396_v58 = vpop.f32.mrb[73].mxu1  ;;  %3779 = vst [vmem:[%s6093_s15 + $0xa0] sm:$0xff] %v5202_v57  ;;  %v4365_v18 = vpop.f32.mrb[137].mxu0 }
 0x39d   : > { %v4483_v36 = vadd.f32 %v3396_v58, %v6249_v61  ;;  %v3398_v38 = vpop.f32.mrb[74].mxu1  ;;  %v5204_v60 = vpop.eup %5203  ;;  %5217 = vtanh.f32 %v4482_v33  ;;  %v4366_v63 = vadd.f32 %v4365_v18, %v4364_v21 }
 0x39e   : > { %v4484_v22 = vadd.f32 %v3398_v38, %v6246_v23  ;;  %v4367_v20 = vpop.f32.mrb[138].mxu0  ;;  %v3400_v51 = vpop.f32.mrb[75].mxu1  ;;  %3786 = vst [vmem:[%s6093_s15 + $0xd8] sm:$0xff] %v5204_v60  ;;  %v3531_v60 = vadd.f32 %v6230_v42, %v6238_v46 }
 0x39f   : > { %5219 = vtanh.f32 %v4483_v36  ;;  %v4485_v6 = vadd.f32 %v3400_v51, %v6249_v61  ;;  %v4368_v16 = vpop.f32.mrb[139].mxu0  ;;  %v5206_v28 = vpop.eup %5205  ;;  %v3609_v56 = vadd.f32 %v4366_v63, %v3512_v11 }
 0x3a0   : > { %5221 = vtanh.f32 %v4484_v22  ;;  %v4369_v29 = vadd.f32 %v4368_v16, %v4367_v20  ;;  %3777 = vst [vmem:[%s6093_s15 + $0x90] sm:$0xff] %v5206_v28 }
 0x3a1   : > { %v5208_v10 = vpop.eup %5207  ;;  %5223 = vtanh.f32 %v4485_v6 }
 0x3a2   : > { %v5210_v32 = vpop.eup %5209  ;;  %3778 = vst [vmem:[%s6093_s15 + $0x98] sm:$0xff] %v5208_v10  ;;  %5225 = vtanh.f32 %v3609_v56  ;;  %v3612_v55 = vadd.f32 %v4369_v29, %v3515_v9  ;;  %v3404_v40 = vpop.f32.mrb[76].mxu1 }
 0x3a3   : > { %v5212_v39 = vpop.eup %5211  ;;  %3784 = vst [vmem:[%s6093_s15 + $0xc8] sm:$0xff] %v5210_v32  ;;  %v4486_v7 = vadd.f32 %v3404_v40, %v6246_v23  ;;  %v4370_v47 = vpop.f32.mrb[140].mxu0 }
 0x3a4   : > { %v5214_v44 = vpop.eup %5213  ;;  %3785 = vst [vmem:[%s6093_s15 + $0xd0] sm:$0xff] %v5212_v39  ;;  %5227 = vtanh.f32 %v3612_v55  ;;  %v3406_v48 = vpop.f32.mrb[77].mxu1  ;;  %v3536_v55 = vadd.f32 %v6233_v35, %v6238_v46 }
 0x3a5   : > { %3793 = vst [vmem:[%s6093_s15 + $0x110] sm:$0xff] %v5214_v44  ;;  %v4487_v62 = vadd.f32 %v3406_v48, %v6249_v61  ;;  %v4371_v43 = vpop.f32.mrb[141].mxu0  ;;  %v3408_v15 = vpop.f32.mrb[78].mxu1  ;;  %5229 = vtanh.f32 %v4486_v7 }
 0x3a6   : > { %v5216_v17 = vpop.eup %5215  ;;  %v4372_v34 = vadd.f32 %v4371_v43, %v4370_v47  ;;  %v4488_v45 = vadd.f32 %v3408_v15, %v6246_v23  ;;  %v4373_v26 = vpop.f32.mrb[142].mxu0  ;;  %v3539_v43 = vadd.f32 %v6235_v0, %v6238_v46 }
 0x3a7   : > { %v3410_v49 = vpop.f32.mrb[79].mxu1  ;;  %3800 = vst [vmem:[%s6093_s15 + $0x148] sm:$0xff] %v5216_v17  ;;  %5231 = vtanh.f32 %v4487_v62  ;;  %v4374_v27 = vpop.f32.mrb[143].mxu0 }
 0x3a8   : > { %v4489_v8 = vadd.f32 %v3410_v49, %v6249_v61  ;;  %v5218_v25 = vpop.eup %5217  ;;  %v3617_v3 = vadd.f32 %v4372_v34, %v3520_v19  ;;  %5233 = vtanh.f32 %v4488_v45  ;;  %v4375_v37 = vadd.f32 %v4374_v27, %v4373_v26 }
 0x3a9   : > { %v5220_v14 = vpop.eup %5219  ;;  %3791 = vst [vmem:[%s6093_s15 + $0x100] sm:$0xff] %v5218_v25 }
 0x3aa   : > { %5235 = vtanh.f32 %v4489_v8  ;;  %v5222_v1 = vpop.eup %5221  ;;  %3792 = vst [vmem:[%s6093_s15 + $0x108] sm:$0xff] %v5220_v14  ;;  %v3620_v30 = vadd.f32 %v4375_v37, %v3523_v54  ;;  %v3414_v53 = vpop.f32.mrb[80].mxu1 }
 0x3ab   : > { %5237 = vtanh.f32 %v3617_v3  ;;  %v5224_v31 = vpop.eup %5223  ;;  %3798 = vst [vmem:[%s6093_s15 + $0x138] sm:$0xff] %v5222_v1  ;;  %v4490_v13 = vadd.f32 %v3414_v53, %v6246_v23  ;;  %v4376_v24 = vpop.f32.mrb[144].mxu0 }
 0x3ac   : > { %v5226_v52 = vpop.eup %5225  ;;  %3799 = vst [vmem:[%s6093_s15 + $0x140] sm:$0xff] %v5224_v31  ;;  %5239 = vtanh.f32 %v3620_v30  ;;  %v3416_v41 = vpop.f32.mrb[81].mxu1 }
 0x3ad   : > { %3807 = vst [vmem:[%s6093_s15 + $0x180] sm:$0xff] %v5226_v52  ;;  %v4491_v50 = vadd.f32 %v3416_v41, %v6249_v61  ;;  %v4377_v5 = vpop.f32.mrb[145].mxu0  ;;  %v3418_v12 = vpop.f32.mrb[82].mxu1  ;;  %5241 = vtanh.f32 %v4490_v13 }
 0x3ae   : > { %v5228_v2 = vpop.eup %5227  ;;  %v4378_v57 = vadd.f32 %v4377_v5, %v4376_v24  ;;  %v4492_v33 = vadd.f32 %v3418_v12, %v6246_v23  ;;  %v4379_v21 = vpop.f32.mrb[146].mxu0 }
 0x3af   : > { %v3420_v58 = vpop.f32.mrb[83].mxu1  ;;  %3814 = vst [vmem:[%s6093_s15 + $0x1b8] sm:$0xff] %v5228_v2  ;;  %5243 = vtanh.f32 %v4491_v50  ;;  %v4380_v18 = vpop.f32.mrb[147].mxu0 }
 0x3b0   : > { %v4493_v36 = vadd.f32 %v3420_v58, %v6249_v61  ;;  %v5230_v38 = vpop.eup %5229  ;;  %v3625_v59 = vadd.f32 %v4378_v57, %v3528_v4  ;;  %5245 = vtanh.f32 %v4492_v33  ;;  %v4381_v11 = vadd.f32 %v4380_v18, %v4379_v21 }
 0x3b1   : > { %v5232_v63 = vpop.eup %5231  ;;  %3805 = vst [vmem:[%s6093_s15 + $0x170] sm:$0xff] %v5230_v38 }
 0x3b2   : > { %5247 = vtanh.f32 %v4493_v36  ;;  %v5234_v22 = vpop.eup %5233  ;;  %3806 = vst [vmem:[%s6093_s15 + $0x178] sm:$0xff] %v5232_v63  ;;  %v3628_v20 = vadd.f32 %v4381_v11, %v3531_v60  ;;  %v3424_v6 = vpop.f32.mrb[84].mxu1 }
 0x3b3   : > { %5249 = vtanh.f32 %v3625_v59  ;;  %3812 = vst [vmem:[%s6093_s15 + $0x1a8] sm:$0xff] %v5234_v22  ;;  %v4494_v42 = vadd.f32 %v3424_v6, %v6246_v23  ;;  %v4382_v28 = vpop.f32.mrb[148].mxu0  ;;  %v3426_v9 = vpop.f32.mrb[85].mxu1 }
 0x3b4   : > { %v5236_v51 = vpop.eup %5235  ;;  %5251 = vtanh.f32 %v3628_v20  ;;  %v4495_v56 = vadd.f32 %v3426_v9, %v6249_v61  ;;  %v4383_v29 = vpop.f32.mrb[149].mxu0 }
 0x3b5   : > { %v5238_v16 = vpop.eup %5237  ;;  %3813 = vst [vmem:[%s6093_s15 + $0x1b0] sm:$0xff] %v5236_v51  ;;  %v3428_v10 = vpop.f32.mrb[86].mxu1  ;;  %5253 = vtanh.f32 %v4494_v42  ;;  %v4384_v39 = vadd.f32 %v4383_v29, %v4382_v28 }
 0x3b6   : > { %3821 = vst [vmem:[%s6093_s15 + $0x1f0] sm:$0xff] %v5238_v16  ;;  %v5240_v32 = vpop.eup %5239  ;;  %v4496_v40 = vadd.f32 %v3428_v10, %v6246_v23  ;;  %v4385_v44 = vpop.f32.mrb[150].mxu0  ;;  %5255 = vtanh.f32 %v4495_v56 }
 0x3b7   : > { %v3430_v7 = vpop.f32.mrb[87].mxu1  ;;  %3828 = vst [vmem:[%s6093_s15 + $0x228] sm:$0xff] %v5240_v32  ;;  %v4386_v48 = vpop.f32.mrb[151].mxu0  ;;  %v3633_v35 = vadd.f32 %v4384_v39, %v3536_v55 }
 0x3b8   : > { %v4497_v47 = vadd.f32 %v3430_v7, %v6249_v61  ;;  %v5242_v62 = vpop.eup %5241  ;;  %5257 = vtanh.f32 %v4496_v40  ;;  %v4387_v15 = vadd.f32 %v4386_v48, %v4385_v44 }
 0x3b9   : > { %v5244_v17 = vpop.eup %5243  ;;  %3819 = vst [vmem:[%s6093_s15 + $0x1e0] sm:$0xff] %v5242_v62 }
 0x3ba   : > { %5259 = vtanh.f32 %v4497_v47  ;;  %v5246_v19 = vpop.eup %5245  ;;  %3820 = vst [vmem:[%s6093_s15 + $0x1e8] sm:$0xff] %v5244_v17  ;;  %v3636_v34 = vadd.f32 %v4387_v15, %v3539_v43  ;;  %v3434_v26 = vpop.f32.mrb[88].mxu1 }
 0x3bb   : > { %5261 = vtanh.f32 %v3633_v35  ;;  %3826 = vst [vmem:[%s6093_s15 + $0x218] sm:$0xff] %v5246_v19  ;;  %v4498_v0 = vadd.f32 %v3434_v26, %v6246_v23  ;;  %v4388_v8 = vpop.f32.mrb[152].mxu0  ;;  %v3436_v27 = vpop.f32.mrb[89].mxu1 }
 0x3bc   : > { %v5248_v45 = vpop.eup %5247  ;;  %5263 = vtanh.f32 %v3636_v34  ;;  %v4499_v25 = vadd.f32 %v3436_v27, %v6249_v61  ;;  %v4389_v54 = vpop.f32.mrb[153].mxu0 }
 0x3bd   : > { %v5250_v49 = vpop.eup %5249  ;;  %3827 = vst [vmem:[%s6093_s15 + $0x220] sm:$0xff] %v5248_v45  ;;  %v3438_v3 = vpop.f32.mrb[90].mxu1  ;;  %5265 = vtanh.f32 %v4498_v0  ;;  %v4390_v14 = vadd.f32 %v4389_v54, %v4388_v8 }
 0x3be   : > { %3835 = vst [vmem:[%s6093_s15 + $0x260] sm:$0xff] %v5250_v49  ;;  %v5252_v37 = vpop.eup %5251  ;;  %v4500_v1 = vadd.f32 %v3438_v3, %v6246_v23  ;;  %v4391_v30 = vpop.f32.mrb[154].mxu0  ;;  %5267 = vtanh.f32 %v4499_v25 }
 0x3bf   : > { %v3440_v31 = vpop.f32.mrb[91].mxu1  ;;  %3842 = vst [vmem:[%s6093_s15 + $0x298] sm:$0xff] %v5252_v37  ;;  %v4392_v52 = vpop.f32.mrb[155].mxu0 }
 0x3c0   : > { %v4501_v53 = vadd.f32 %v3440_v31, %v6249_v61  ;;  %v5254_v13 = vpop.eup %5253  ;;  %5269 = vtanh.f32 %v4500_v1  ;;  %v4393_v24 = vadd.f32 %v4392_v52, %v4391_v30 }
 0x3c1   : > { %v5256_v41 = vpop.eup %5255  ;;  %3833 = vst [vmem:[%s6093_s15 + $0x250] sm:$0xff] %v5254_v13 }
 0x3c2   : > { %5271 = vtanh.f32 %v4501_v53  ;;  %v5258_v50 = vpop.eup %5257  ;;  %3834 = vst [vmem:[%s6093_s15 + $0x258] sm:$0xff] %v5256_v41  ;;  %v3444_v12 = vpop.f32.mrb[92].mxu1 }
 0x3c3   : > { %3840 = vst [vmem:[%s6093_s15 + $0x288] sm:$0xff] %v5258_v50  ;;  %v4502_v4 = vadd.f32 %v3444_v12, %v6246_v23  ;;  %v3446_v57 = vpop.f32.mrb[93].mxu1 }
 0x3c4   : > { %v5260_v5 = vpop.eup %5259  ;;  %v4503_v33 = vadd.f32 %v3446_v57, %v6249_v61  ;;  %v3448_v21 = vpop.f32.mrb[94].mxu1 }
 0x3c5   : > { %v5262_v2 = vpop.eup %5261  ;;  %3841 = vst [vmem:[%s6093_s15 + $0x290] sm:$0xff] %v5260_v5  ;;  %5273 = vtanh.f32 %v4502_v4  ;;  %v4504_v36 = vadd.f32 %v3448_v21, %v6246_v23  ;;  %v3450_v18 = vpop.f32.mrb[95].mxu1 }
 0x3c6   : > { %3849 = vst [vmem:[%s6093_s15 + $0x2d0] sm:$0xff] %v5262_v2  ;;  %v5264_v58 = vpop.eup %5263  ;;  %5275 = vtanh.f32 %v4503_v33  ;;  %v4505_v38 = vadd.f32 %v3450_v18, %v6249_v61 }
 0x3c7   : > { %3856 = vst [vmem:[%s6093_s15 + $0x308] sm:$0xff] %v5264_v58  ;;  %v5266_v60 = vpop.eup %5265  ;;  %5277 = vtanh.f32 %v4504_v36 }
 0x3c8   : > { %v5268_v59 = vpop.eup %5267  ;;  %3847 = vst [vmem:[%s6093_s15 + $0x2c0] sm:$0xff] %v5266_v60  ;;  %5279 = vtanh.f32 %v4505_v38 }
 0x3c9   : > { %3848 = vst [vmem:[%s6093_s15 + $0x2c8] sm:$0xff] %v5268_v59 }
 0x3ca   : > { %v5270_v11 = vpop.eup %5269  ;;  %v4324_v22 = vpop.f32.mrb[96].mxu1 }
 0x3cb   : > { %3854 = vst [vmem:[%s6093_s15 + $0x2f8] sm:$0xff] %v5270_v11  ;;  %v4325_v23 = vpop.f32.mrb[97].mxu1 }
 0x3cc   : > { %v5272_v63 = vpop.eup %5271  ;;  %v4326_v20 = vadd.f32 %v4325_v23, %v4324_v22  ;;  %v4327_v51 = vpop.f32.mrb[98].mxu1 }
 0x3cd   : > { %3855 = vst [vmem:[%s6093_s15 + $0x300] sm:$0xff] %v5272_v63  ;;  %v4328_v6 = vpop.f32.mrb[99].mxu1 }
 0x3ce   : > { %v3544_v61 = vadd.f32 %v4326_v20, %v6238_v46  ;;  %v4329_v16 = vadd.f32 %v4328_v6, %v4327_v51 }
 0x3cf   : > { %v5274_v42 = vpop.eup %5273 }
 0x3d0   : > { %v5276_v28 = vpop.eup %5275  ;;  %3861 = vst [vmem:[%s6093_s15 + $0x330] sm:$0xff] %v5274_v42  ;;  %v3641_v9 = vadd.f32 %v4390_v14, %v3544_v61  ;;  %v3547_v56 = vadd.f32 %v4329_v16, %v6238_v46 }
 0x3d1   : > { %v5278_v29 = vpop.eup %5277  ;;  %3862 = vst [vmem:[%s6093_s15 + $0x338] sm:$0xff] %v5276_v28 }
 0x3d2   : > { %v5280_v10 = vpop.eup %5279  ;;  %3868 = vst [vmem:[%s6093_s15 + $0x368] sm:$0xff] %v5278_v29  ;;  %5281 = vtanh.f32 %v3641_v9  ;;  %v3644_v32 = vadd.f32 %v4393_v24, %v3547_v56 }
 0x3d3   : > { %3869 = vst [vmem:[%s6093_s15 + $0x370] sm:$0xff] %v5280_v10 }
 0x3d4   : > { %5283 = vtanh.f32 %v3644_v32 }
 0x3dc   : > { %v5282_v55 = vpop.eup %5281 }
 0x3dd   : > { %3863 = vst [vmem:[%s6093_s15 + $0x340] sm:$0xff] %v5282_v55 }
 0x3de   : > { %v5284_v39 = vpop.eup %5283 }
 0x3df   : > { %3870 = vst [vmem:[%s6093_s15 + $0x378] sm:$0xff] %v5284_v39 }
 0x3e0 PF: > { %s18_s24 = sadd.s32 1, %s5323_s24  }
 0x3e1   : > { %p15_p3 = scmp.ge.s32.totalorder %s18_s24, 4  }
 0x3e3   :  { %17 = sbr.rel (!%p15_p3) target bundleno = 1 (0x1), region = 83 }
 0x3ea   :  { %3895 = vsyncpa [#allocation3], 1 }
 0x3eb   :  { %3897 = vsyncpa [#allocation3 + $0x1], 1 }

</bundles_post_ra>
